<compile_context>
chip_gen: v7x
topology: tpu7x:2x2x1
jax: 0.10.0
libtpu: 0.0.40
codegen_flags: <defaults>
</compile_context>

<pallas_src>
import functools

import jax
import jax.numpy as jnp
from jax import lax
from jax.experimental import pallas as pl
from jax.experimental.pallas import tpu as pltpu

# ----------------------------- config ---------------------------------------
B = 2            # batch size
A = 256          # total anchors (16x16 grid, 1 anchor each)
MAX_OBJ = 8      # padded number of gt objects per image
NUM_CLASSES = 4  # including background
IOU_THRESHOLD = 0.5
NEG_POS_RATIO = 3

_NEG_FILL = -1e30  # "exclude positives from negative ranking" fill value


# --------------------------- per-image Pallas kernel -------------------------
def _multibox_image_kernel(locs_ref, scores_ref, gt_ref, anc_ref, out_ref, *,
                           iou_threshold, neg_pos_ratio):
    f32 = jnp.float32
    _, c_pad, a = scores_ref.shape          # (1, C_pad, A)
    _, m, _ = gt_ref.shape                  # (1, M_pad, 8)

    # ---- anchors, channel-first (1, 4, A), cxcywh ---------------------------
    anc = anc_ref[...]
    acx = anc[:, 0:1, :]
    acy = anc[:, 1:2, :]
    aw = anc[:, 2:3, :]
    ah = anc[:, 3:4, :]                      # (1, 1, A)
    ax0 = acx - 0.5 * aw
    ay0 = acy - 0.5 * ah
    ax1 = acx + 0.5 * aw
    ay1 = acy + 0.5 * ah
    area_a = (ax1 - ax0) * (ay1 - ay0)       # (1, 1, A)

    # ---- ground truth pack (1, M, 8): [x0, y0, x1, y1, label, valid, 0, 0] --
    gt = gt_ref[...]
    gx0 = gt[:, :, 0:1]
    gy0 = gt[:, :, 1:2]
    gx1 = gt[:, :, 2:3]
    gy1 = gt[:, :, 3:4]                      # (1, M, 1)
    glab = gt[:, :, 4:5]
    valid = gt[:, :, 5:6] > 0.5              # (1, M, 1) bool

    # ---- pairwise IoU: gt rows (sublanes) x anchors (lanes) ------------------
    ixmin = jnp.maximum(gx0, ax0)
    iymin = jnp.maximum(gy0, ay0)
    ixmax = jnp.minimum(gx1, ax1)
    iymax = jnp.minimum(gy1, ay1)
    iw = jnp.maximum(ixmax - ixmin, 0.0)
    ih = jnp.maximum(iymax - iymin, 0.0)
    inter = iw * ih                           # (1, M, A)
    area_g = (gx1 - gx0) * (gy1 - gy0)        # (1, M, 1)
    union = area_g + area_a - inter
    # exact divide on purpose: IoU feeds the 0.5-threshold matching decision.
    iou = inter / (union + 1e-7)
    iou = jnp.where(valid, iou, -1.0)         # mask padded / invalid gts

    # ---- anchor <-> gt matching ----------------------------------------------
    iota_m = lax.broadcasted_iota(jnp.int32, (1, m, a), 1).astype(f32)
    iota_a = lax.broadcasted_iota(jnp.int32, (1, m, a), 2).astype(f32)

    a_best_iou = jnp.max(iou, axis=1, keepdims=True)                      # (1,1,A)
    a_best_idx = jnp.min(jnp.where(iou == a_best_iou, iota_m, float(m)),
                         axis=1, keepdims=True)                           # (1,1,A)
    g_best_iou = jnp.max(iou, axis=2, keepdims=True)                      # (1,M,1)
    g_best_idx = jnp.min(jnp.where(iou == g_best_iou, iota_a, float(a)),
                         axis=2, keepdims=True)                           # (1,M,1)

    pos = a_best_iou > iou_threshold                                      # (1,1,A)
    # per-gt forcing (vectorised over the M axis): the best anchor of every
    # valid gt with IoU > 1e-5 becomes positive.  The reference's conditional
    # reassignment of anchor_best_gt_idx never fires (per-anchor max >= any
    # per-gt IoU at that anchor), so matched indices stay the plain argmax.
    force = (iota_a == g_best_idx) & (g_best_iou > 1e-5)                  # (1,M,A)
    forced = jnp.max(force.astype(f32), axis=1, keepdims=True) > 0.5      # (1,1,A)
    pos = pos | forced
    posf = pos.astype(f32)

    # ---- gather matched gt boxes / labels via one-hot over M -----------------
    onehot = (iota_m == a_best_idx).astype(f32)                           # (1,M,A)

    def gather(col):                                                      # (1,M,1)->(1,1,A)
        return jnp.sum(onehot * col, axis=1, keepdims=True)

    mx0 = gather(gx0)
    my0 = gather(gy0)
    mx1 = gather(gx1)
    my1 = gather(gy1)
    mlabel = gather(glab)                                                 # (1,1,A)
    true_cls = jnp.where(pos, mlabel + 1.0, 0.0)                          # 0 = background

    # ---- per-anchor cross-entropy (channel-first scores, vectorised) --------
    scores = scores_ref[...]                                              # (1,Cp,A)
    smax = jnp.max(scores, axis=1, keepdims=True)                         # (1,1,A)
    denom = jnp.sum(jnp.exp(scores - smax), axis=1, keepdims=True)        # (1,1,A)
    cls_iota = lax.broadcasted_iota(jnp.int32, (1, c_pad, a), 1).astype(f32)
    tgt = jnp.sum(jnp.where(cls_iota == true_cls, scores, 0.0),
                  axis=1, keepdims=True)                                  # (1,1,A)
    ce = smax + jnp.log(denom) - tgt                                      # (1,1,A)

    # ---- box-target encoding + SmoothL1 --------------------------------------
    locs = locs_ref[...]                                                  # (1,4,A)
    px = locs[:, 0:1, :]
    py = locs[:, 1:2, :]
    pw = locs[:, 2:3, :]
    ph = locs[:, 3:4, :]
    gcx = 0.5 * (mx0 + mx1)
    gcy = 0.5 * (my0 + my1)
    gw = mx1 - mx0
    gh = my1 - my0
    tx = (gcx - acx) / aw
    ty = (gcy - acy) / ah
    tw = jnp.log(gw / aw + 1e-7)
    th = jnp.log(gh / ah + 1e-7)

    def sl1(d):
        ad = jnp.abs(d)
        return jnp.where(ad < 1.0, 0.5 * d * d, ad - 0.5)

    per_anchor_loc = (sl1(px - tx) + sl1(py - ty)
                      + sl1(pw - tw) + sl1(ph - th))                      # (1,1,A)

    # ---- hard-negative mining: compare-based rank, row-sum on the MXU --------
    iota_j = lax.broadcasted_iota(jnp.int32, (1, a, a), 1)                # sublane idx
    iota_i = lax.broadcasted_iota(jnp.int32, (1, a, a), 2)                # lane idx
    eye_f = (iota_j == iota_i).astype(f32)                                # (1,A,A)

    masked = jnp.where(pos, _NEG_FILL, ce)                                # (1,1,A)
    # exact row->column relayout of the masked losses (one non-zero per sum)
    masked_col = jnp.sum(masked * eye_f, axis=2, keepdims=True)           # (1,A,1)

    greater = masked_col > masked                                         # (1,A,A): L_j > L_i
    tie = (masked_col == masked) & (iota_j < iota_i)                      # stable tie-break
    cmp_f = (greater | tie).astype(f32)

    # rank_i = sum_j cmp[j, i]; computed as ones(8,A) @ cmp(A,A) on the MXU
    # (8 identical rows keep the M dim sublane-aligned; row 0 is used).
    ones_rows = jnp.ones((1, 8, a), f32)
    rank8 = lax.dot_general(ones_rows, cmp_f,
                            dimension_numbers=(((2,), (1,)), ((0,), (0,))),
                            preferred_element_type=f32)                   # (1,8,A)
    rank = rank8[:, 0:1, :]                                               # (1,1,A)

    npos = jnp.sum(posf, axis=2, keepdims=True)                           # (1,1,1)
    k_pos = jnp.maximum(
        jnp.minimum(float(neg_pos_ratio) * npos, float(a) - npos), 0.0)
    k_def = float(min(neg_pos_ratio * 20, a))
    k_eff = jnp.where(npos > 0.0, k_pos, k_def)                           # (1,1,1)
    hard = (rank < k_eff) & jnp.logical_not(pos)                          # (1,1,A)
    finalm_f = jnp.where(hard, 1.0, posf)                                 # pos | hard

    # ---- per-image partial sums ----------------------------------------------
    loc_sum = jnp.sum(per_anchor_loc * posf, axis=2, keepdims=True)       # (1,1,1)
    conf_sum = jnp.sum(ce * finalm_f, axis=2, keepdims=True)              # (1,1,1)
    n_sel = jnp.sum(finalm_f, axis=2, keepdims=True)                      # (1,1,1)
    n_hard = n_sel - npos

    slot = lax.broadcasted_iota(jnp.int32, (1, 1, 4), 2)
    out_ref[...] = jnp.where(
        slot == 0, loc_sum,
        jnp.where(slot == 1, conf_sum,
                  jnp.where(slot == 2, npos, n_hard)))


# ------------------------------ wrapper --------------------------------------
@jax.jit
def multibox_loss(predicted_locs, predicted_scores, gt_boxes_xyxy, gt_labels,
                  gt_valid, anchors_cxcywh):
    """predicted_locs (B,A,4), predicted_scores (B,A,C) in natural layout."""
    f32 = jnp.float32
    b, a, num_classes = predicted_scores.shape
    m = gt_boxes_xyxy.shape[1]
    m_pad = ((m + 7) // 8) * 8
    c_pad = ((num_classes + 7) // 8) * 8

    # One-time tiny XLA transposes: channel-first, lane-dense kernel inputs.
    locs_cf = jnp.transpose(predicted_locs.astype(f32), (0, 2, 1))        # (B,4,A)
    scores_cf = jnp.transpose(predicted_scores.astype(f32), (0, 2, 1))    # (B,C,A)
    if c_pad > num_classes:
        scores_cf = jnp.concatenate(
            [scores_cf,
             jnp.full((b, c_pad - num_classes, a), _NEG_FILL, f32)], axis=1)
    anchors_cf = jnp.transpose(anchors_cxcywh.astype(f32))[None]          # (1,4,A)

    # gt pack (B, M_pad, 8): [x0, y0, x1, y1, label, valid, 0, 0]
    gt_pack = jnp.concatenate(
        [gt_boxes_xyxy.astype(f32),
         gt_labels.astype(f32)[..., None],
         gt_valid.astype(f32)[..., None],
         jnp.zeros((b, m, 2), f32)], axis=-1)
    if m_pad > m:
        gt_pack = jnp.concatenate(
            [gt_pack, jnp.zeros((b, m_pad - m, 8), f32)], axis=1)

    kernel = functools.partial(_multibox_image_kernel,
                               iou_threshold=IOU_THRESHOLD,
                               neg_pos_ratio=NEG_POS_RATIO)

    parts = pl.pallas_call(
        kernel,
        out_shape=jax.ShapeDtypeStruct((b, 1, 4), f32),
        grid=(b,),
        in_specs=[
            pl.BlockSpec((1, 4, a), lambda i: (i, 0, 0)),
            pl.BlockSpec((1, c_pad, a), lambda i: (i, 0, 0)),
            pl.BlockSpec((1, m_pad, 8), lambda i: (i, 0, 0)),
            pl.BlockSpec((1, 4, a), lambda i: (0, 0, 0)),
        ],
        out_specs=pl.BlockSpec((1, 1, 4), lambda i: (i, 0, 0)),
        compiler_params=pltpu.CompilerParams(
            dimension_semantics=("parallel",),
            vmem_limit_bytes=32 * 1024 * 1024),
    )(locs_cf, scores_cf, gt_pack, anchors_cf)

    # ---- final scalar branching (host-side .item() logic of the reference) ---
    loc_sum = jnp.sum(parts[:, 0, 0])
    conf_sum = jnp.sum(parts[:, 0, 1])
    n_pos = jnp.sum(parts[:, 0, 2])
    n_hard = jnp.sum(parts[:, 0, 3])

    np_safe = jnp.maximum(n_pos, 1.0)
    nh_safe = jnp.maximum(n_hard, 1.0)
    total_else = jnp.where(
        n_hard > 0.0, conf_sum / nh_safe,
        jnp.where(conf_sum > 1e-7, conf_sum / float(b), 0.0))
    has_pos = n_pos > 0.0
    total = jnp.where(has_pos, (loc_sum + conf_sum) / np_safe, total_else)
    loc_val = jnp.where(has_pos, loc_sum / np_safe, 0.0)
    conf_val = jnp.where(has_pos, conf_sum / np_safe, total_else)
    return total, loc_val, conf_val


# --------------------------------- main --------------------------------------
if __name__ == "__main__":
    key = jax.random.PRNGKey(0)
    k1, k2, k3, k4, k5 = jax.random.split(key, 5)

    # Deterministic anchors: 16x16 grid of 0.1x0.1 boxes (A = 256).
    g = (jnp.arange(16, dtype=jnp.float32) + 0.5) / 16.0
    cy, cx = jnp.meshgrid(g, g, indexing="ij")
    anchors_cxcywh = jnp.stack(
        [cx.reshape(-1), cy.reshape(-1),
         jnp.full((A,), 0.1), jnp.full((A,), 0.1)], axis=-1)              # (A, 4)

    # Padded ground truth (variable-length lists replaced by a validity mask).
    cxcy = jax.random.uniform(k1, (B, MAX_OBJ, 2), minval=0.2, maxval=0.8)
    wh = jax.random.uniform(k2, (B, MAX_OBJ, 2), minval=0.05, maxval=0.4)
    gt_boxes_xyxy = jnp.clip(
        jnp.concatenate([cxcy - wh / 2, cxcy + wh / 2], axis=-1), 0.0, 1.0)
    gt_labels = jax.random.randint(k3, (B, MAX_OBJ), 0, NUM_CLASSES - 1)
    num_obj = jnp.array([3, 5], dtype=jnp.int32)
    gt_valid = jnp.arange(MAX_OBJ)[None, :] < num_obj[:, None]            # (B, M)
    gt_boxes_xyxy = jnp.where(gt_valid[:, :, None], gt_boxes_xyxy, 0.0)
    gt_labels = jnp.where(gt_valid, gt_labels, 0)

    predicted_locs = 0.1 * jax.random.normal(k4, (B, A, 4), dtype=jnp.float32)
    predicted_scores = jax.random.normal(k5, (B, A, NUM_CLASSES), dtype=jnp.float32)

    total_loss, loc_val, conf_val = multibox_loss(
        predicted_locs, predicted_scores, gt_boxes_xyxy, gt_labels,
        gt_valid, anchors_cxcywh)
    jax.block_until_ready((total_loss, loc_val, conf_val))
    print("KERNEL_OK")
</pallas_src>

<mosaic_0001>
module attributes {stable_mosaic.version = 11 : i64} {
  func.func @_multibox_image_kernel(%arg0: i32, %arg1: memref<1x4x256xf32, #tpu.memory_space<vmem>>, %arg2: memref<1x8x256xf32, #tpu.memory_space<vmem>>, %arg3: memref<1x8x8xf32, #tpu.memory_space<vmem>>, %arg4: memref<1x4x256xf32, #tpu.memory_space<vmem>>, %arg5: memref<1x1x4xf32, #tpu.memory_space<vmem>>) attributes {dimension_semantics = [#tpu.dimension_semantics<parallel>], iteration_bounds = array<i64: 2>, scalar_prefetch = 0 : i64, scratch_operands = 0 : i64, tpu.core_type = #tpu.core_type<tc>, window_params = [{transform_indices = @transform_0, window_bounds = array<i64: 1, 4, 256>}, {transform_indices = @transform_1, window_bounds = array<i64: 1, 8, 256>}, {transform_indices = @transform_2, window_bounds = array<i64: 1, 8, 8>}, {pipeline_mode = #tpu.pipeline_mode<synchronous>, transform_indices = @transform_3, window_bounds = array<i64: 1, 4, 256>}, {transform_indices = @transform_4, window_bounds = array<i64: 1, 1, 4>}]} {
    %c0 = arith.constant 0 : index
    %c0_0 = arith.constant 0 : index
    %c0_1 = arith.constant 0 : index
    %0 = vector.load %arg4[%c0, %c0_0, %c0_1] : memref<1x4x256xf32, #tpu.memory_space<vmem>>, vector<1x4x256xf32>
    %1 = vector.extract_strided_slice %0 {offsets = [0, 0, 0], sizes = [1, 1, 256], strides = [1, 1, 1]} : vector<1x4x256xf32> to vector<1x1x256xf32>
    %2 = vector.extract_strided_slice %0 {offsets = [0, 1, 0], sizes = [1, 1, 256], strides = [1, 1, 1]} : vector<1x4x256xf32> to vector<1x1x256xf32>
    %3 = vector.extract_strided_slice %0 {offsets = [0, 2, 0], sizes = [1, 1, 256], strides = [1, 1, 1]} : vector<1x4x256xf32> to vector<1x1x256xf32>
    %4 = vector.extract_strided_slice %0 {offsets = [0, 3, 0], sizes = [1, 1, 256], strides = [1, 1, 1]} : vector<1x4x256xf32> to vector<1x1x256xf32>
    %cst = arith.constant 5.000000e-01 : f32
    %5 = vector.broadcast %cst : f32 to vector<1x1x256xf32>
    %6 = arith.mulf %5, %3 : vector<1x1x256xf32>
    %7 = arith.subf %1, %6 : vector<1x1x256xf32>
    %cst_2 = arith.constant 5.000000e-01 : f32
    %8 = vector.broadcast %cst_2 : f32 to vector<1x1x256xf32>
    %9 = arith.mulf %8, %4 : vector<1x1x256xf32>
    %10 = arith.subf %2, %9 : vector<1x1x256xf32>
    %cst_3 = arith.constant 5.000000e-01 : f32
    %11 = vector.broadcast %cst_3 : f32 to vector<1x1x256xf32>
    %12 = arith.mulf %11, %3 : vector<1x1x256xf32>
    %13 = arith.addf %1, %12 : vector<1x1x256xf32>
    %cst_4 = arith.constant 5.000000e-01 : f32
    %14 = vector.broadcast %cst_4 : f32 to vector<1x1x256xf32>
    %15 = arith.mulf %14, %4 : vector<1x1x256xf32>
    %16 = arith.addf %2, %15 : vector<1x1x256xf32>
    %17 = arith.subf %13, %7 : vector<1x1x256xf32>
    %18 = arith.subf %16, %10 : vector<1x1x256xf32>
    %19 = arith.mulf %17, %18 : vector<1x1x256xf32>
    %c0_5 = arith.constant 0 : index
    %c0_6 = arith.constant 0 : index
    %c0_7 = arith.constant 0 : index
    %20 = vector.load %arg3[%c0_5, %c0_6, %c0_7] : memref<1x8x8xf32, #tpu.memory_space<vmem>>, vector<1x8x8xf32>
    %21 = vector.extract_strided_slice %20 {offsets = [0, 0, 0], sizes = [1, 8, 1], strides = [1, 1, 1]} : vector<1x8x8xf32> to vector<1x8x1xf32>
    %22 = vector.extract_strided_slice %20 {offsets = [0, 0, 1], sizes = [1, 8, 1], strides = [1, 1, 1]} : vector<1x8x8xf32> to vector<1x8x1xf32>
    %23 = vector.extract_strided_slice %20 {offsets = [0, 0, 2], sizes = [1, 8, 1], strides = [1, 1, 1]} : vector<1x8x8xf32> to vector<1x8x1xf32>
    %24 = vector.extract_strided_slice %20 {offsets = [0, 0, 3], sizes = [1, 8, 1], strides = [1, 1, 1]} : vector<1x8x8xf32> to vector<1x8x1xf32>
    %25 = vector.extract_strided_slice %20 {offsets = [0, 0, 4], sizes = [1, 8, 1], strides = [1, 1, 1]} : vector<1x8x8xf32> to vector<1x8x1xf32>
    %26 = vector.extract_strided_slice %20 {offsets = [0, 0, 5], sizes = [1, 8, 1], strides = [1, 1, 1]} : vector<1x8x8xf32> to vector<1x8x1xf32>
    %cst_8 = arith.constant 5.000000e-01 : f32
    %27 = vector.broadcast %cst_8 : f32 to vector<1x8x1xf32>
    %28 = arith.cmpf ogt, %26, %27 : vector<1x8x1xf32>
    %29 = vector.broadcast %21 : vector<1x8x1xf32> to vector<1x8x256xf32>
    %30 = vector.broadcast %7 : vector<1x1x256xf32> to vector<1x8x256xf32>
    %31 = arith.maximumf %29, %30 : vector<1x8x256xf32>
    %32 = vector.broadcast %22 : vector<1x8x1xf32> to vector<1x8x256xf32>
    %33 = vector.broadcast %10 : vector<1x1x256xf32> to vector<1x8x256xf32>
    %34 = arith.maximumf %32, %33 : vector<1x8x256xf32>
    %35 = vector.broadcast %23 : vector<1x8x1xf32> to vector<1x8x256xf32>
    %36 = vector.broadcast %13 : vector<1x1x256xf32> to vector<1x8x256xf32>
    %37 = arith.minimumf %35, %36 : vector<1x8x256xf32>
    %38 = vector.broadcast %24 : vector<1x8x1xf32> to vector<1x8x256xf32>
    %39 = vector.broadcast %16 : vector<1x1x256xf32> to vector<1x8x256xf32>
    %40 = arith.minimumf %38, %39 : vector<1x8x256xf32>
    %41 = arith.subf %37, %31 : vector<1x8x256xf32>
    %cst_9 = arith.constant 0.000000e+00 : f32
    %42 = vector.broadcast %cst_9 : f32 to vector<1x8x256xf32>
    %43 = arith.maximumf %41, %42 : vector<1x8x256xf32>
    %44 = arith.subf %40, %34 : vector<1x8x256xf32>
    %cst_10 = arith.constant 0.000000e+00 : f32
    %45 = vector.broadcast %cst_10 : f32 to vector<1x8x256xf32>
    %46 = arith.maximumf %44, %45 : vector<1x8x256xf32>
    %47 = arith.mulf %43, %46 : vector<1x8x256xf32>
    %48 = arith.subf %23, %21 : vector<1x8x1xf32>
    %49 = arith.subf %24, %22 : vector<1x8x1xf32>
    %50 = arith.mulf %48, %49 : vector<1x8x1xf32>
    %51 = vector.broadcast %50 : vector<1x8x1xf32> to vector<1x8x256xf32>
    %52 = vector.broadcast %19 : vector<1x1x256xf32> to vector<1x8x256xf32>
    %53 = arith.addf %51, %52 : vector<1x8x256xf32>
    %54 = arith.subf %53, %47 : vector<1x8x256xf32>
    %cst_11 = arith.constant 1.000000e-07 : f32
    %55 = vector.broadcast %cst_11 : f32 to vector<1x8x256xf32>
    %56 = arith.addf %54, %55 : vector<1x8x256xf32>
    %57 = arith.divf %47, %56 : vector<1x8x256xf32>
    %cst_12 = arith.constant -1.000000e+00 : f32
    %58 = vector.shape_cast %28 : vector<1x8x1xi1> to vector<1x8x1xi1>
    %59 = vector.broadcast %58 : vector<1x8x1xi1> to vector<1x8x256xi1>
    %60 = vector.broadcast %cst_12 : f32 to vector<1x8x256xf32>
    %61 = arith.select %59, %57, %60 : vector<1x8x256xi1>, vector<1x8x256xf32>
    %62 = tpu.iota {dimensions = array<i32: 1>} : vector<1x8x256xi32>
    %63 = arith.sitofp %62 : vector<1x8x256xi32> to vector<1x8x256xf32>
    %64 = tpu.iota {dimensions = array<i32: 2>} : vector<1x8x256xi32>
    %65 = arith.sitofp %64 : vector<1x8x256xi32> to vector<1x8x256xf32>
    %cst_13 = arith.constant dense<0xFF800000> : vector<1x256xf32>
    %66 = vector.multi_reduction <maximumf>, %61, %cst_13 [1] : vector<1x8x256xf32> to vector<1x256xf32>
    %67 = vector.shape_cast %66 : vector<1x256xf32> to vector<1x1x256xf32>
    %68 = vector.broadcast %67 : vector<1x1x256xf32> to vector<1x8x256xf32>
    %69 = arith.cmpf oeq, %61, %68 : vector<1x8x256xf32>
    %cst_14 = arith.constant 8.000000e+00 : f32
    %70 = vector.broadcast %cst_14 : f32 to vector<1x8x256xf32>
    %71 = arith.select %69, %63, %70 : vector<1x8x256xi1>, vector<1x8x256xf32>
    %cst_15 = arith.constant dense<0x7F800000> : vector<1x256xf32>
    %72 = vector.multi_reduction <minimumf>, %71, %cst_15 [1] : vector<1x8x256xf32> to vector<1x256xf32>
    %73 = vector.shape_cast %72 : vector<1x256xf32> to vector<1x1x256xf32>
    %cst_16 = arith.constant dense<0xFF800000> : vector<1x8xf32>
    %74 = vector.multi_reduction <maximumf>, %61, %cst_16 [2] : vector<1x8x256xf32> to vector<1x8xf32>
    %75 = vector.shape_cast %74 : vector<1x8xf32> to vector<1x8x1xf32>
    %76 = vector.broadcast %75 : vector<1x8x1xf32> to vector<1x8x256xf32>
    %77 = arith.cmpf oeq, %61, %76 : vector<1x8x256xf32>
    %cst_17 = arith.constant 2.560000e+02 : f32
    %78 = vector.broadcast %cst_17 : f32 to vector<1x8x256xf32>
    %79 = arith.select %77, %65, %78 : vector<1x8x256xi1>, vector<1x8x256xf32>
    %cst_18 = arith.constant dense<0x7F800000> : vector<1x8xf32>
    %80 = vector.multi_reduction <minimumf>, %79, %cst_18 [2] : vector<1x8x256xf32> to vector<1x8xf32>
    %81 = vector.shape_cast %80 : vector<1x8xf32> to vector<1x8x1xf32>
    %cst_19 = arith.constant 5.000000e-01 : f32
    %82 = vector.broadcast %cst_19 : f32 to vector<1x1x256xf32>
    %83 = arith.cmpf ogt, %67, %82 : vector<1x1x256xf32>
    %84 = vector.broadcast %81 : vector<1x8x1xf32> to vector<1x8x256xf32>
    %85 = arith.cmpf oeq, %65, %84 : vector<1x8x256xf32>
    %cst_20 = arith.constant 9.99999974E-6 : f32
    %86 = vector.broadcast %cst_20 : f32 to vector<1x8x1xf32>
    %87 = arith.cmpf ogt, %75, %86 : vector<1x8x1xf32>
    %88 = vector.broadcast %87 : vector<1x8x1xi1> to vector<1x8x256xi1>
    %89 = arith.andi %85, %88 : vector<1x8x256xi1>
    %90 = arith.extui %89 : vector<1x8x256xi1> to vector<1x8x256xi32>
    %91 = arith.sitofp %90 : vector<1x8x256xi32> to vector<1x8x256xf32>
    %cst_21 = arith.constant dense<0xFF800000> : vector<1x256xf32>
    %92 = vector.multi_reduction <maximumf>, %91, %cst_21 [1] : vector<1x8x256xf32> to vector<1x256xf32>
    %93 = vector.shape_cast %92 : vector<1x256xf32> to vector<1x1x256xf32>
    %cst_22 = arith.constant 5.000000e-01 : f32
    %94 = vector.broadcast %cst_22 : f32 to vector<1x1x256xf32>
    %95 = arith.cmpf ogt, %93, %94 : vector<1x1x256xf32>
    %96 = arith.ori %83, %95 : vector<1x1x256xi1>
    %97 = arith.extui %96 : vector<1x1x256xi1> to vector<1x1x256xi32>
    %98 = arith.sitofp %97 : vector<1x1x256xi32> to vector<1x1x256xf32>
    %99 = vector.broadcast %73 : vector<1x1x256xf32> to vector<1x8x256xf32>
    %100 = arith.cmpf oeq, %63, %99 : vector<1x8x256xf32>
    %101 = arith.extui %100 : vector<1x8x256xi1> to vector<1x8x256xi32>
    %102 = arith.sitofp %101 : vector<1x8x256xi32> to vector<1x8x256xf32>
    %103 = vector.broadcast %21 : vector<1x8x1xf32> to vector<1x8x256xf32>
    %104 = arith.mulf %102, %103 : vector<1x8x256xf32>
    %cst_23 = arith.constant dense<0.000000e+00> : vector<1x256xf32>
    %105 = vector.multi_reduction <add>, %104, %cst_23 [1] : vector<1x8x256xf32> to vector<1x256xf32>
    %106 = vector.shape_cast %105 : vector<1x256xf32> to vector<1x1x256xf32>
    %107 = vector.broadcast %22 : vector<1x8x1xf32> to vector<1x8x256xf32>
    %108 = arith.mulf %102, %107 : vector<1x8x256xf32>
    %cst_24 = arith.constant dense<0.000000e+00> : vector<1x256xf32>
    %109 = vector.multi_reduction <add>, %108, %cst_24 [1] : vector<1x8x256xf32> to vector<1x256xf32>
    %110 = vector.shape_cast %109 : vector<1x256xf32> to vector<1x1x256xf32>
    %111 = vector.broadcast %23 : vector<1x8x1xf32> to vector<1x8x256xf32>
    %112 = arith.mulf %102, %111 : vector<1x8x256xf32>
    %cst_25 = arith.constant dense<0.000000e+00> : vector<1x256xf32>
    %113 = vector.multi_reduction <add>, %112, %cst_25 [1] : vector<1x8x256xf32> to vector<1x256xf32>
    %114 = vector.shape_cast %113 : vector<1x256xf32> to vector<1x1x256xf32>
    %115 = vector.broadcast %24 : vector<1x8x1xf32> to vector<1x8x256xf32>
    %116 = arith.mulf %102, %115 : vector<1x8x256xf32>
    %cst_26 = arith.constant dense<0.000000e+00> : vector<1x256xf32>
    %117 = vector.multi_reduction <add>, %116, %cst_26 [1] : vector<1x8x256xf32> to vector<1x256xf32>
    %118 = vector.shape_cast %117 : vector<1x256xf32> to vector<1x1x256xf32>
    %119 = vector.broadcast %25 : vector<1x8x1xf32> to vector<1x8x256xf32>
    %120 = arith.mulf %102, %119 : vector<1x8x256xf32>
    %cst_27 = arith.constant dense<0.000000e+00> : vector<1x256xf32>
    %121 = vector.multi_reduction <add>, %120, %cst_27 [1] : vector<1x8x256xf32> to vector<1x256xf32>
    %122 = vector.shape_cast %121 : vector<1x256xf32> to vector<1x1x256xf32>
    %cst_28 = arith.constant 1.000000e+00 : f32
    %123 = vector.broadcast %cst_28 : f32 to vector<1x1x256xf32>
    %124 = arith.addf %122, %123 : vector<1x1x256xf32>
    %cst_29 = arith.constant 0.000000e+00 : f32
    %125 = vector.broadcast %cst_29 : f32 to vector<1x1x256xf32>
    %126 = arith.select %96, %124, %125 : vector<1x1x256xi1>, vector<1x1x256xf32>
    %c0_30 = arith.constant 0 : index
    %c0_31 = arith.constant 0 : index
    %c0_32 = arith.constant 0 : index
    %127 = vector.load %arg2[%c0_30, %c0_31, %c0_32] : memref<1x8x256xf32, #tpu.memory_space<vmem>>, vector<1x8x256xf32>
    %cst_33 = arith.constant dense<0xFF800000> : vector<1x256xf32>
    %128 = vector.multi_reduction <maximumf>, %127, %cst_33 [1] : vector<1x8x256xf32> to vector<1x256xf32>
    %129 = vector.shape_cast %128 : vector<1x256xf32> to vector<1x1x256xf32>
    %130 = vector.broadcast %129 : vector<1x1x256xf32> to vector<1x8x256xf32>
    %131 = arith.subf %127, %130 : vector<1x8x256xf32>
    %132 = math.exp %131 : vector<1x8x256xf32>
    %cst_34 = arith.constant dense<0.000000e+00> : vector<1x256xf32>
    %133 = vector.multi_reduction <add>, %132, %cst_34 [1] : vector<1x8x256xf32> to vector<1x256xf32>
    %134 = vector.shape_cast %133 : vector<1x256xf32> to vector<1x1x256xf32>
    %135 = tpu.iota {dimensions = array<i32: 1>} : vector<1x8x256xi32>
    %136 = arith.sitofp %135 : vector<1x8x256xi32> to vector<1x8x256xf32>
    %137 = vector.broadcast %126 : vector<1x1x256xf32> to vector<1x8x256xf32>
    %138 = arith.cmpf oeq, %136, %137 : vector<1x8x256xf32>
    %cst_35 = arith.constant 0.000000e+00 : f32
    %139 = vector.broadcast %cst_35 : f32 to vector<1x8x256xf32>
    %140 = arith.select %138, %127, %139 : vector<1x8x256xi1>, vector<1x8x256xf32>
    %cst_36 = arith.constant dense<0.000000e+00> : vector<1x256xf32>
    %141 = vector.multi_reduction <add>, %140, %cst_36 [1] : vector<1x8x256xf32> to vector<1x256xf32>
    %142 = vector.shape_cast %141 : vector<1x256xf32> to vector<1x1x256xf32>
    %143 = math.log %134 : vector<1x1x256xf32>
    %144 = arith.addf %129, %143 : vector<1x1x256xf32>
    %145 = arith.subf %144, %142 : vector<1x1x256xf32>
    %c0_37 = arith.constant 0 : index
    %c0_38 = arith.constant 0 : index
    %c0_39 = arith.constant 0 : index
    %146 = vector.load %arg1[%c0_37, %c0_38, %c0_39] : memref<1x4x256xf32, #tpu.memory_space<vmem>>, vector<1x4x256xf32>
    %147 = vector.extract_strided_slice %146 {offsets = [0, 0, 0], sizes = [1, 1, 256], strides = [1, 1, 1]} : vector<1x4x256xf32> to vector<1x1x256xf32>
    %148 = vector.extract_strided_slice %146 {offsets = [0, 1, 0], sizes = [1, 1, 256], strides = [1, 1, 1]} : vector<1x4x256xf32> to vector<1x1x256xf32>
    %149 = vector.extract_strided_slice %146 {offsets = [0, 2, 0], sizes = [1, 1, 256], strides = [1, 1, 1]} : vector<1x4x256xf32> to vector<1x1x256xf32>
    %150 = vector.extract_strided_slice %146 {offsets = [0, 3, 0], sizes = [1, 1, 256], strides = [1, 1, 1]} : vector<1x4x256xf32> to vector<1x1x256xf32>
    %151 = arith.addf %106, %114 : vector<1x1x256xf32>
    %cst_40 = arith.constant 5.000000e-01 : f32
    %152 = vector.broadcast %cst_40 : f32 to vector<1x1x256xf32>
    %153 = arith.mulf %152, %151 : vector<1x1x256xf32>
    %154 = arith.addf %110, %118 : vector<1x1x256xf32>
    %cst_41 = arith.constant 5.000000e-01 : f32
    %155 = vector.broadcast %cst_41 : f32 to vector<1x1x256xf32>
    %156 = arith.mulf %155, %154 : vector<1x1x256xf32>
    %157 = arith.subf %114, %106 : vector<1x1x256xf32>
    %158 = arith.subf %118, %110 : vector<1x1x256xf32>
    %159 = arith.subf %153, %1 : vector<1x1x256xf32>
    %160 = arith.divf %159, %3 : vector<1x1x256xf32>
    %161 = arith.subf %156, %2 : vector<1x1x256xf32>
    %162 = arith.divf %161, %4 : vector<1x1x256xf32>
    %163 = arith.divf %157, %3 : vector<1x1x256xf32>
    %cst_42 = arith.constant 1.000000e-07 : f32
    %164 = vector.broadcast %cst_42 : f32 to vector<1x1x256xf32>
    %165 = arith.addf %163, %164 : vector<1x1x256xf32>
    %166 = math.log %165 : vector<1x1x256xf32>
    %167 = arith.divf %158, %4 : vector<1x1x256xf32>
    %cst_43 = arith.constant 1.000000e-07 : f32
    %168 = vector.broadcast %cst_43 : f32 to vector<1x1x256xf32>
    %169 = arith.addf %167, %168 : vector<1x1x256xf32>
    %170 = math.log %169 : vector<1x1x256xf32>
    %171 = arith.subf %147, %160 : vector<1x1x256xf32>
    %172 = math.absf %171 : vector<1x1x256xf32>
    %cst_44 = arith.constant 1.000000e+00 : f32
    %173 = vector.broadcast %cst_44 : f32 to vector<1x1x256xf32>
    %174 = arith.cmpf olt, %172, %173 : vector<1x1x256xf32>
    %cst_45 = arith.constant 5.000000e-01 : f32
    %175 = vector.broadcast %cst_45 : f32 to vector<1x1x256xf32>
    %176 = arith.mulf %175, %171 : vector<1x1x256xf32>
    %177 = arith.mulf %176, %171 : vector<1x1x256xf32>
    %cst_46 = arith.constant 5.000000e-01 : f32
    %178 = vector.broadcast %cst_46 : f32 to vector<1x1x256xf32>
    %179 = arith.subf %172, %178 : vector<1x1x256xf32>
    %180 = arith.select %174, %177, %179 : vector<1x1x256xi1>, vector<1x1x256xf32>
    %181 = arith.subf %148, %162 : vector<1x1x256xf32>
    %182 = math.absf %181 : vector<1x1x256xf32>
    %cst_47 = arith.constant 1.000000e+00 : f32
    %183 = vector.broadcast %cst_47 : f32 to vector<1x1x256xf32>
    %184 = arith.cmpf olt, %182, %183 : vector<1x1x256xf32>
    %cst_48 = arith.constant 5.000000e-01 : f32
    %185 = vector.broadcast %cst_48 : f32 to vector<1x1x256xf32>
    %186 = arith.mulf %185, %181 : vector<1x1x256xf32>
    %187 = arith.mulf %186, %181 : vector<1x1x256xf32>
    %cst_49 = arith.constant 5.000000e-01 : f32
    %188 = vector.broadcast %cst_49 : f32 to vector<1x1x256xf32>
    %189 = arith.subf %182, %188 : vector<1x1x256xf32>
    %190 = arith.select %184, %187, %189 : vector<1x1x256xi1>, vector<1x1x256xf32>
    %191 = arith.addf %180, %190 : vector<1x1x256xf32>
    %192 = arith.subf %149, %166 : vector<1x1x256xf32>
    %193 = math.absf %192 : vector<1x1x256xf32>
    %cst_50 = arith.constant 1.000000e+00 : f32
    %194 = vector.broadcast %cst_50 : f32 to vector<1x1x256xf32>
    %195 = arith.cmpf olt, %193, %194 : vector<1x1x256xf32>
    %cst_51 = arith.constant 5.000000e-01 : f32
    %196 = vector.broadcast %cst_51 : f32 to vector<1x1x256xf32>
    %197 = arith.mulf %196, %192 : vector<1x1x256xf32>
    %198 = arith.mulf %197, %192 : vector<1x1x256xf32>
    %cst_52 = arith.constant 5.000000e-01 : f32
    %199 = vector.broadcast %cst_52 : f32 to vector<1x1x256xf32>
    %200 = arith.subf %193, %199 : vector<1x1x256xf32>
    %201 = arith.select %195, %198, %200 : vector<1x1x256xi1>, vector<1x1x256xf32>
    %202 = arith.addf %191, %201 : vector<1x1x256xf32>
    %203 = arith.subf %150, %170 : vector<1x1x256xf32>
    %204 = math.absf %203 : vector<1x1x256xf32>
    %cst_53 = arith.constant 1.000000e+00 : f32
    %205 = vector.broadcast %cst_53 : f32 to vector<1x1x256xf32>
    %206 = arith.cmpf olt, %204, %205 : vector<1x1x256xf32>
    %cst_54 = arith.constant 5.000000e-01 : f32
    %207 = vector.broadcast %cst_54 : f32 to vector<1x1x256xf32>
    %208 = arith.mulf %207, %203 : vector<1x1x256xf32>
    %209 = arith.mulf %208, %203 : vector<1x1x256xf32>
    %cst_55 = arith.constant 5.000000e-01 : f32
    %210 = vector.broadcast %cst_55 : f32 to vector<1x1x256xf32>
    %211 = arith.subf %204, %210 : vector<1x1x256xf32>
    %212 = arith.select %206, %209, %211 : vector<1x1x256xi1>, vector<1x1x256xf32>
    %213 = arith.addf %202, %212 : vector<1x1x256xf32>
    %214 = tpu.iota {dimensions = array<i32: 1>} : vector<1x256x256xi32>
    %215 = tpu.iota {dimensions = array<i32: 2>} : vector<1x256x256xi32>
    %216 = arith.cmpi eq, %214, %215 : vector<1x256x256xi32>
    %217 = arith.extui %216 : vector<1x256x256xi1> to vector<1x256x256xi32>
    %218 = arith.sitofp %217 : vector<1x256x256xi32> to vector<1x256x256xf32>
    %cst_56 = arith.constant -1.000000e+30 : f32
    %219 = vector.broadcast %cst_56 : f32 to vector<1x1x256xf32>
    %220 = arith.select %96, %219, %145 : vector<1x1x256xi1>, vector<1x1x256xf32>
    %221 = vector.broadcast %220 : vector<1x1x256xf32> to vector<1x256x256xf32>
    %222 = arith.mulf %221, %218 : vector<1x256x256xf32>
    %cst_57 = arith.constant dense<0.000000e+00> : vector<1x256xf32>
    %223 = vector.multi_reduction <add>, %222, %cst_57 [2] : vector<1x256x256xf32> to vector<1x256xf32>
    %224 = vector.shape_cast %223 : vector<1x256xf32> to vector<1x256x1xf32>
    %225 = vector.broadcast %224 : vector<1x256x1xf32> to vector<1x256x256xf32>
    %226 = vector.broadcast %220 : vector<1x1x256xf32> to vector<1x256x256xf32>
    %227 = arith.cmpf ogt, %225, %226 : vector<1x256x256xf32>
    %228 = vector.broadcast %224 : vector<1x256x1xf32> to vector<1x256x256xf32>
    %229 = vector.broadcast %220 : vector<1x1x256xf32> to vector<1x256x256xf32>
    %230 = arith.cmpf oeq, %228, %229 : vector<1x256x256xf32>
    %231 = arith.cmpi slt, %214, %215 : vector<1x256x256xi32>
    %232 = arith.andi %230, %231 : vector<1x256x256xi1>
    %233 = arith.ori %227, %232 : vector<1x256x256xi1>
    %234 = arith.extui %233 : vector<1x256x256xi1> to vector<1x256x256xi32>
    %235 = arith.sitofp %234 : vector<1x256x256xi32> to vector<1x256x256xf32>
    %cst_58 = arith.constant 1.000000e+00 : f32
    %236 = vector.broadcast %cst_58 : f32 to vector<1x8x256xf32>
    %cst_59 = arith.constant dense<0.000000e+00> : vector<1x8x256xf32>
    %237 = tpu.matmul %236, %235, %cst_59 {dimension_numbers = #tpu.dot_dimension_numbers<[2], [1], [1], [2], [0, 0, 0, 1, 1, 2], [0], [0]>} : vector<1x8x256xf32>, vector<1x256x256xf32>, vector<1x8x256xf32> -> vector<1x8x256xf32>
    %238 = vector.extract_strided_slice %237 {offsets = [0, 0, 0], sizes = [1, 1, 256], strides = [1, 1, 1]} : vector<1x8x256xf32> to vector<1x1x256xf32>
    %cst_60 = arith.constant dense<0.000000e+00> : vector<1x1xf32>
    %239 = vector.multi_reduction <add>, %98, %cst_60 [2] : vector<1x1x256xf32> to vector<1x1xf32>
    %240 = vector.shape_cast %239 : vector<1x1xf32> to vector<1x1x1xf32>
    %cst_61 = arith.constant 3.000000e+00 : f32
    %241 = vector.broadcast %cst_61 : f32 to vector<1x1x1xf32>
    %242 = arith.mulf %241, %240 : vector<1x1x1xf32>
    %cst_62 = arith.constant 2.560000e+02 : f32
    %243 = vector.broadcast %cst_62 : f32 to vector<1x1x1xf32>
    %244 = arith.subf %243, %240 : vector<1x1x1xf32>
    %245 = arith.minimumf %242, %244 : vector<1x1x1xf32>
    %cst_63 = arith.constant 0.000000e+00 : f32
    %246 = vector.broadcast %cst_63 : f32 to vector<1x1x1xf32>
    %247 = arith.maximumf %245, %246 : vector<1x1x1xf32>
    %cst_64 = arith.constant 0.000000e+00 : f32
    %248 = vector.broadcast %cst_64 : f32 to vector<1x1x1xf32>
    %249 = arith.cmpf ogt, %240, %248 : vector<1x1x1xf32>
    %cst_65 = arith.constant 6.000000e+01 : f32
    %250 = vector.broadcast %cst_65 : f32 to vector<1x1x1xf32>
    %251 = arith.select %249, %247, %250 : vector<1x1x1xi1>, vector<1x1x1xf32>
    %252 = vector.broadcast %251 : vector<1x1x1xf32> to vector<1x1x256xf32>
    %253 = arith.cmpf olt, %238, %252 : vector<1x1x256xf32>
    %cst_66 = arith.constant dense<true> : vector<1x1x256xi1>
    %254 = arith.xori %96, %cst_66 : vector<1x1x256xi1>
    %255 = arith.andi %253, %254 : vector<1x1x256xi1>
    %cst_67 = arith.constant 1.000000e+00 : f32
    %256 = vector.broadcast %cst_67 : f32 to vector<1x1x256xf32>
    %257 = arith.select %255, %256, %98 : vector<1x1x256xi1>, vector<1x1x256xf32>
    %258 = arith.mulf %213, %98 : vector<1x1x256xf32>
    %cst_68 = arith.constant dense<0.000000e+00> : vector<1x1xf32>
    %259 = vector.multi_reduction <add>, %258, %cst_68 [2] : vector<1x1x256xf32> to vector<1x1xf32>
    %260 = vector.shape_cast %259 : vector<1x1xf32> to vector<1x1x1xf32>
    %261 = arith.mulf %145, %257 : vector<1x1x256xf32>
    %cst_69 = arith.constant dense<0.000000e+00> : vector<1x1xf32>
    %262 = vector.multi_reduction <add>, %261, %cst_69 [2] : vector<1x1x256xf32> to vector<1x1xf32>
    %263 = vector.shape_cast %262 : vector<1x1xf32> to vector<1x1x1xf32>
    %cst_70 = arith.constant dense<0.000000e+00> : vector<1x1xf32>
    %264 = vector.multi_reduction <add>, %257, %cst_70 [2] : vector<1x1x256xf32> to vector<1x1xf32>
    %265 = vector.shape_cast %264 : vector<1x1xf32> to vector<1x1x1xf32>
    %266 = arith.subf %265, %240 : vector<1x1x1xf32>
    %267 = tpu.iota {dimensions = array<i32: 2>} : vector<1x1x4xi32>
    %c0_i32 = arith.constant 0 : i32
    %268 = vector.broadcast %c0_i32 : i32 to vector<1x1x4xi32>
    %269 = arith.cmpi eq, %267, %268 : vector<1x1x4xi32>
    %c1_i32 = arith.constant 1 : i32
    %270 = vector.broadcast %c1_i32 : i32 to vector<1x1x4xi32>
    %271 = arith.cmpi eq, %267, %270 : vector<1x1x4xi32>
    %c2_i32 = arith.constant 2 : i32
    %272 = vector.broadcast %c2_i32 : i32 to vector<1x1x4xi32>
    %273 = arith.cmpi eq, %267, %272 : vector<1x1x4xi32>
    %274 = vector.shape_cast %240 : vector<1x1x1xf32> to vector<1x1x1xf32>
    %275 = vector.broadcast %274 : vector<1x1x1xf32> to vector<1x1x4xf32>
    %276 = vector.shape_cast %266 : vector<1x1x1xf32> to vector<1x1x1xf32>
    %277 = vector.broadcast %276 : vector<1x1x1xf32> to vector<1x1x4xf32>
    %278 = arith.select %273, %275, %277 : vector<1x1x4xi1>, vector<1x1x4xf32>
    %279 = vector.shape_cast %263 : vector<1x1x1xf32> to vector<1x1x1xf32>
    %280 = vector.broadcast %279 : vector<1x1x1xf32> to vector<1x1x4xf32>
    %281 = arith.select %271, %280, %278 : vector<1x1x4xi1>, vector<1x1x4xf32>
    %282 = vector.shape_cast %260 : vector<1x1x1xf32> to vector<1x1x1xf32>
    %283 = vector.broadcast %282 : vector<1x1x1xf32> to vector<1x1x4xf32>
    %284 = arith.select %269, %283, %281 : vector<1x1x4xi1>, vector<1x1x4xf32>
    %c0_71 = arith.constant 0 : index
    %c0_72 = arith.constant 0 : index
    %c0_73 = arith.constant 0 : index
    %285 = vector.load %arg5[%c0_71, %c0_72, %c0_73] : memref<1x1x4xf32, #tpu.memory_space<vmem>>, vector<1x1x4xf32>
    tpu.vector_store %arg5[%c0_71, %c0_72, %c0_73], %284 {strides = array<i32>} : memref<1x1x4xf32, #tpu.memory_space<vmem>>, vector<1x1x4xf32>,
    return
  }
  func.func @transform_0(%arg0: i32) -> (i32, i32, i32) {
    %c0_i32 = arith.constant 0 : i32
    %c0_i32_0 = arith.constant 0 : i32
    %c0_i32_1 = arith.constant 0 : i32
    return %arg0, %c0_i32, %c0_i32_0 : i32, i32, i32
  }
  func.func @transform_1(%arg0: i32) -> (i32, i32, i32) {
    %c0_i32 = arith.constant 0 : i32
    %c0_i32_0 = arith.constant 0 : i32
    %c0_i32_1 = arith.constant 0 : i32
    return %arg0, %c0_i32, %c0_i32_0 : i32, i32, i32
  }
  func.func @transform_2(%arg0: i32) -> (i32, i32, i32) {
    %c0_i32 = arith.constant 0 : i32
    %c0_i32_0 = arith.constant 0 : i32
    %c0_i32_1 = arith.constant 0 : i32
    return %arg0, %c0_i32, %c0_i32_0 : i32, i32, i32
  }
  func.func @transform_3(%arg0: i32) -> (i32, i32, i32) {
    %c0_i32 = arith.constant 0 : i32
    %c0_i32_0 = arith.constant 0 : i32
    %c0_i32_1 = arith.constant 0 : i32
    %c0_i32_2 = arith.constant 0 : i32
    return %c0_i32, %c0_i32_0, %c0_i32_1 : i32, i32, i32
  }
  func.func @transform_4(%arg0: i32) -> (i32, i32, i32) {
    %c0_i32 = arith.constant 0 : i32
    %c0_i32_0 = arith.constant 0 : i32
    %c0_i32_1 = arith.constant 0 : i32
    return %arg0, %c0_i32, %c0_i32_0 : i32, i32, i32
  }
}

</mosaic_0001>

<bundles_post_ra>
// kernel: multibox_loss.1
= control target key start
LH: loop header
LB: loop body
LE: loop exit
PB: predicated region body
PF: predicated region fallthrough
CT: control target
= control target key end

     0   :  { %s2157_s15 = smov 0   ;;  %s3066_s0 = inlined_call_operand.vmem [shape: f32[2,4,256], index: 0, kind: input, shape index: {}]   ;;  %s3067_s1 = inlined_call_operand.vmem [shape: f32[2,8,256], index: 1, kind: input, shape index: {}]   ;;  %s3068_s2 = inlined_call_operand.vmem [shape: f32[2,8,8], index: 2, kind: input, shape index: {}]   ;;  %s3069_s3 = inlined_call_operand.vmem [shape: f32[1,4,256], index: 3, kind: input, shape index: {}]   ;;  %s3070_s4 = inlined_call_operand.vmem [shape: f32[2,1,4], index: 4, kind: output, shape index: {}]  }
   0x1 LB: > { %s1804_s16 = sadd.s32 4294967295, %s2118_s15   ;;  %p1808_p0 = scmp.ge.s32.totalorder %s2118_s15, 1  ;;  %s2118_s15 = sphi %s2157_s15, %s14_s15  }
   0x2   : > { %p181_p1 = scmp.lt.s32.totalorder %s2118_s15, 3 }
   0x4   : > { %p182_p2 = pnand %p1808_p0, %p181_p1 }
   0x5   : > { %p214_p3 = scmp.lt.s32.totalorder (!%p182_p2), %s1804_s16, 1  ;;  %v2120_v0 = vmov (!%p182_p2), 0   ;;  %v2121_v1 = vmov (!%p182_p2), 2   ;;  %s2122_s21 = smov (!%p182_p2), 2   ;;  %v2123_v3 = vmov (!%p182_p2), 1   ;;  %v2124_v4 = vmov (!%p182_p2), 3  }
   0x6   : > { %185 = sbr.rel (%p182_p2) target bundleno = 1356 (0x54c), region = 36  ;;  %2076 = vset.pattern.permute.xlu1 (!%p182_p2), %v2120_v0  ;;  %2078 = vset.pattern.permute.xlu0 (!%p182_p2), %v2121_v1  ;;  %s2125_s22 = smov (!%p182_p2), 127   ;;  %v2126_v8 = vmov (!%p182_p2), 5   ;;  %v2127_v11 = vmov (!%p182_p2), 4   ;;  %v2185_v12 = vld [vmem:[%s3069_s3] sm:$0xff] (!%p182_p2)  ;;  %v253_v14 = vlaneseq (!%p182_p2) }
   0x7   : > { %v232_v13 = vmul.f32 (!%p182_p2), 0.5, %v2185_v12 }
   0x8   : > { %v2189_v16 = vshrl.u32 (!%p182_p2), %v253_v14, 7 }
   0x9   : > { %v234_v15 = vrot.slane (!%p182_p2), %v232_v13, 6 }
   0xa   : > { %v2194_v19 = vsub.s32 (!%p182_p2), 0, %v2189_v16  ;;  %v2198_v21 = vsub.s32 (!%p182_p2), 4, %v2189_v16  ;;  %v2201_v22 = vsub.s32 (!%p182_p2), 1, %v2189_v16  ;;  %v2204_v23 = vsub.s32 (!%p182_p2), 5, %v2189_v16 }
   0xb   : > { %v235_v17 = vrot.slane (!%p182_p2), %v234_v15, 4 }
   0xd   : > { %s3118_s16 = smov (!%p214_p3, %s1804_s16), 1  ;;  %v237_v20 = vsub.f32 %v2185_v12, %v235_v17  ;;  %v238_v24 = vadd.f32 %v235_v17, %v2185_v12 }
   0xe   : > { %s1990_s17 = sshll.u32 %s3118_s16, 3  ;;  %s1991_s28 = sshll.u32 %s3118_s16, 4 }
   0xf   : > { %s227_s20 = scalar_lea.vmem %s3068_s2, %s1990_s17  ;;  %v239_v25 = vsub.f32 %v238_v24, %v237_v20  ;;  %v256_v26 = vrot.slane %v237_v20, %v2194_v19  ;;  %v260_v27 = vrot.slane %v237_v20, %v2198_v21  ;;  %v280_v28 = vrot.slane %v237_v20, %v2201_v22  ;;  %s218_s27 = scalar_lea.vmem %s3066_s0, %s1990_s17 }
  0x10   : > { %v2173_v2 = vld [vmem:[%s227_s20] sm:$0xff]  ;;  %v284_v29 = vrot.slane %v237_v20, %v2204_v23  ;;  %v329_v31 = vrot.slane %v238_v24, %v2201_v22  ;;  %v333_v32 = vrot.slane %v238_v24, %v2204_v23  ;;  %v305_v33 = vrot.slane %v238_v24, %v2194_v19  ;;  %s223_s5 = scalar_lea.vmem %s3067_s1, %s1991_s28  ;;  %s230_s8 = scalar_lea.vmem %s3070_s4, %s3118_s16 }
  0x11   : > { %356 = vrot.lane.b32.xlu0 %v2173_v2, %s2122_s21  ;;  %249 = vperm.xlu1 %2076, %v2173_v2   ;;  %vm246_vm0 = vcmp.gt.f32.partialorder %v2173_v2, 0.5  ;;  %v309_v34 = vrot.slane %v238_v24, %v2198_v21  ;;  %v1814_v35 = vrot.slane %v239_v25, 9  ;;  %v266_v36 = vrot.slane %v256_v26, %v2194_v19 }
  0x12   : > { %v399_v7 = vsel %vm246_vm0, 1, %v2120_v0  ;;  %v270_v37 = vrot.slane %v260_v27, %v2194_v19  ;;  %v290_v38 = vrot.slane %v280_v28, %v2201_v22  ;;  %v294_v39 = vrot.slane %v284_v29, %v2201_v22 }
  0x13   : > { %v339_v40 = vrot.slane %v329_v31, %v2201_v22  ;;  %v343_v41 = vrot.slane %v333_v32, %v2201_v22  ;;  %v315_v42 = vrot.slane %v305_v33, %v2194_v19  ;;  %v319_v43 = vrot.slane %v309_v34, %v2194_v19 }
  0x14   : > { %v244_v46 = vmul.f32 %v1814_v35, %v239_v25 }
  0x15   : > { %2077 = vset.pattern.permute.xlu1 %v2123_v3 }
  0x16   : > { %274 = vperm.xlu1 %2077, %v2173_v2   ;;  %v374_v55 = vrot.slane %v244_v46, %v2194_v19  ;;  %v378_v56 = vrot.slane %v244_v46, %v2198_v21 }
  0x18   : > { %v384_v61 = vrot.slane %v374_v55, %v2194_v19  ;;  %v388_v62 = vrot.slane %v378_v56, %v2194_v19  ;;  %v683_v55 = vsub.s32 7, %v2189_v16 }
  0x1a   : > { %2079 = vset.pattern.permute.xlu1 %v2124_v4 }
  0x1b   : > { %323 = vperm.xlu1 %2079, %v2173_v2  }
  0x1f   : > { %2080 = vset.pattern.permute.xlu1 %v2121_v1 }
  0x83   : > { %v357_v5 = vpop.permute.xlu0 %356 }
  0x84   : > { %v359_v6 = vsub.f32 %v2173_v2, %v357_v5 }
  0x86   : > { %361 = vrot.lane.b32.xlu0 %v359_v6, %s2125_s22 }
  0x8a   : > { %298 = vperm.xlu0 %2078, %v2173_v2  }
  0x8e   : > { %2081 = vset.pattern.permute.xlu0 %v2126_v8 }
  0x8f   : > { %401 = vperm.xlu0 %2081, %v399_v7  }
  0x90   : > { %v2191_v18 = vpop.permute.xlu1 %249 }
  0x91   : > { %v271_v47 = vmax.f32 %v2191_v18, %v266_v36  ;;  %v272_v48 = vmax.f32 %v2191_v18, %v270_v37 }
  0x93   : > { %2083 = vset.pattern.permute.xlu0 %v2127_v11 }
  0x95   : > { %v2211_v30 = vpop.permute.xlu1 %274 }
  0x96   : > { %v295_v49 = vmax.f32 %v2211_v30, %v290_v38  ;;  %v296_v50 = vmax.f32 %v2211_v30, %v294_v39  ;;  %v2252_v39 = vcvt.s32.f32 %v2189_v16 }
  0x9a   : > { %v2225_v44 = vpop.permute.xlu1 %323 }
  0x9b   : > { %v344_v51 = vmin.f32 %v2225_v44, %v339_v40  ;;  %v345_v52 = vmin.f32 %v2225_v44, %v343_v41 }
  0x9d   : > { %v350_v57 = vsub.f32 %v344_v51, %v295_v49  ;;  %v351_v58 = vsub.f32 %v345_v52, %v296_v50  ;;  %v653_v49 = vsub.s32 2, %v2189_v16  ;;  %v657_v51 = vsub.s32 6, %v2189_v16 }
  0x9f   : > { %v352_v63 = vmax.f32 %v350_v57, 0.0  ;;  %v353_v0 = vmax.f32 %v351_v58, 0.0  ;;  %v654_v57 = vrot.slane %v2185_v12, %v653_v49 }
  0xf8   : > { %v362_v9 = vpop.permute.xlu0 %361 }
  0xf9   : > { %v364_v10 = vmul.f32 %v362_v9, %v359_v6 }
  0xfb   : > { %367 = vperm.xlu1 %2080, %v364_v10  }
  0xff   : > { %2082 = vset.pattern.permute.xlu1 %v2127_v11 }
 0x109   : > { %v2227_v45 = vpop.permute.xlu0 %298 }
 0x10a   : > { %v320_v53 = vmin.f32 %v2227_v45, %v315_v42  ;;  %v321_v54 = vmin.f32 %v2227_v45, %v319_v43 }
 0x10c   : > { %v346_v59 = vsub.f32 %v320_v53, %v271_v47  ;;  %v347_v60 = vsub.f32 %v321_v54, %v272_v48  ;;  %v679_v53 = vsub.s32 3, %v2189_v16 }
 0x10e   : > { %v348_v1 = vmax.f32 %v346_v59, 0.0  ;;  %v349_v3 = vmax.f32 %v347_v60, 0.0  ;;  %v402_v15 = vpop.permute.xlu0 %401  ;;  %v658_v59 = vrot.slane %v2185_v12, %v657_v51 }
 0x10f   : > { %vm403_vm1 = vcmp.eq.s32.totalorder %v402_v15, 1 }
 0x110   : > { %v354_v5 = vmul.f32 %v352_v63, %v348_v1  ;;  %v355_v6 = vmul.f32 %v353_v0, %v349_v3 }
 0x17a   : > { %v368_v4 = vpop.permute.xlu1 %367 }
 0x17b   : > { %v389_v7 = vadd.f32 %v384_v61, %v368_v4  ;;  %v390_v8 = vadd.f32 %v388_v62, %v368_v4  ;;  %v680_v61 = vrot.slane %v2185_v12, %v679_v53  ;;  %v684_v62 = vrot.slane %v2185_v12, %v683_v55 }
 0x17c   : > { %v672_v4 = vrot.slane %v2185_v12, %v2204_v23 }
 0x17d   : > { %v391_v9 = vsub.f32 %v389_v7, %v354_v5  ;;  %v392_v10 = vsub.f32 %v390_v8, %v355_v6 }
 0x17f   : > { %v393_v11 = vadd.f32 1e-07, %v391_v9  ;;  %v394_v13 = vadd.f32 1e-07, %v392_v10 }
 0x181   : > { %2084 = vrcp.f32 %v393_v11 }
 0x182   : > { %2086 = vrcp.f32 %v394_v13 }
 0x183   : > { %2088 = vrcp.f32 %v654_v57 }
 0x184   : > { %2090 = vrcp.f32 %v658_v59 }
 0x185   : > { %2092 = vrcp.f32 %v680_v61 }
 0x186   : > { %2094 = vrcp.f32 %v684_v62 }
 0x18b   : > { %v2085_v17 = vpop.eup %2084 }
 0x18c   : > { %v2087_v20 = vpop.eup %2086  ;;  %v396_v24 = vmul.f32 %v2085_v17, %v354_v5  ;;  %v646_v5 = vrot.slane %v2185_v12, %v2198_v21 }
 0x18d   : > { %v398_v25 = vmul.f32 %v2087_v20, %v355_v6  ;;  %v2128_v6 = vmov 0.0  }
 0x18e   : > { %v2241_v26 = vsel %vm403_vm1, %v396_v24, -1.0 }
 0x18f   : > { %v2243_v27 = vsel %vm403_vm1, %v398_v25, -1.0  ;;  %v414_v28 = vrot.slane %v2241_v26, 4 }
 0x190   : > { %v420_v29 = vrot.slane %v2243_v27, 4  ;;  %v442_v31 = vmax.f32 %v2241_v26, %v2243_v27 }
 0x191   : > { %v415_v32 = vmax.f32 %v2241_v26, %v414_v28 }
 0x192   : > { %v421_v33 = vmax.f32 %v2243_v27, %v420_v29  ;;  %443 = vmax.xlane.f32.xlu1 %v442_v31 }
 0x193   : > { %v416_v34 = vrot.slane %v415_v32, 2 }
 0x194   : > { %v422_v35 = vrot.slane %v421_v33, 2 }
 0x195   : > { %v417_v36 = vmax.f32 %v415_v32, %v416_v34 }
 0x196   : > { %v423_v37 = vmax.f32 %v421_v33, %v422_v35 }
 0x197   : > { %v418_v38 = vrot.slane %v417_v36, 1 }
 0x198   : > { %v424_v40 = vrot.slane %v423_v37, 1 }
 0x199   : > { %v2254_v41 = vmax.f32 %v417_v36, %v418_v38 }
 0x19a   : > { %v2256_v42 = vmax.f32 %v423_v37, %v424_v40  ;;  %v2303_v37 = vpop.eup %2088 }
 0x19b   : > { %vm426_vm2 = vcmp.eq.f32.partialorder %v2241_v26, %v2254_v41  ;;  %vm452_vm1 = vcmp.gt.f32.partialorder %v2254_v41, 0.5 }
 0x19c   : > { %vm427_vm3 = vcmp.eq.f32.partialorder %v2243_v27, %v2256_v42  ;;  %v428_v43 = vsel %vm426_vm2, %v2252_v39, 8.0 }
 0x19d   : > { %v429_v46 = vsel %vm427_vm3, %v2252_v39, 8.0  ;;  %v430_v47 = vrot.slane %v428_v43, 4  ;;  %vm453_vm3 = vcmp.gt.f32.partialorder %v2256_v42, 0.5 }
 0x19e   : > { %v436_v48 = vrot.slane %v429_v46, 4 }
 0x19f   : > { %v431_v50 = vmin.f32 %v428_v43, %v430_v47 }
 0x1a0   : > { %v437_v52 = vmin.f32 %v429_v46, %v436_v48  ;;  %v2305_v46 = vpop.eup %2090 }
 0x1a1   : > { %v432_v54 = vrot.slane %v431_v50, 2 }
 0x1a2   : > { %v438_v56 = vrot.slane %v437_v52, 2 }
 0x1a3   : > { %v433_v58 = vmin.f32 %v431_v50, %v432_v54  ;;  %548 = vperm.xlu1 %2082, %v2173_v2   ;;  %v642_v2 = vrot.slane %v2185_v12, %v2194_v19  ;;  %v2093_v50 = vpop.eup %2092 }
 0x1a4   : > { %v439_v60 = vmin.f32 %v437_v52, %v438_v56  ;;  %v2095_v55 = vpop.eup %2094 }
 0x1a5   : > { %v434_v63 = vrot.slane %v433_v58, 1 }
 0x1a6   : > { %v440_v0 = vrot.slane %v439_v60, 1 }
 0x1a7   : > { %v435_v1 = vmin.f32 %v433_v58, %v434_v63 }
 0x1a8   : > { %v441_v3 = vmin.f32 %v439_v60, %v440_v0 }
 0x1a9   : > { %vm485_vm4 = vcmp.eq.f32.partialorder %v2252_v39, %v435_v1 }
 0x1aa   : > { %vm486_vm5 = vcmp.eq.f32.partialorder %v2252_v39, %v441_v3  ;;  %v2282_v7 = vsel %vm485_vm4, 1.0, %v2128_v6 }
 0x1ab   : > { %v2285_v8 = vsel %vm486_vm5, 1.0, %v2128_v6  ;;  %v491_v9 = vmul.f32 %v2282_v7, %v2191_v18  ;;  %v505_v10 = vmul.f32 %v2282_v7, %v2211_v30  ;;  %v519_v11 = vmul.f32 %v2282_v7, %v2227_v45 }
 0x1ac   : > { %v492_v13 = vmul.f32 %v2285_v8, %v2191_v18  ;;  %v506_v15 = vmul.f32 %v2285_v8, %v2211_v30  ;;  %v520_v17 = vmul.f32 %v2285_v8, %v2227_v45  ;;  %v534_v20 = vmul.f32 %v2285_v8, %v2225_v44 }
 0x1ad   : > { %v493_v24 = vrot.slane %v491_v9, 4  ;;  %v507_v25 = vrot.slane %v505_v10, 4  ;;  %v521_v28 = vrot.slane %v519_v11, 4  ;;  %v533_v29 = vmul.f32 %v2282_v7, %v2225_v44 }
 0x1ae   : > { %v499_v31 = vrot.slane %v492_v13, 4  ;;  %v513_v32 = vrot.slane %v506_v15, 4  ;;  %v527_v33 = vrot.slane %v520_v17, 4  ;;  %v541_v34 = vrot.slane %v534_v20, 4 }
 0x1af   : > { %v494_v18 = vadd.f32 %v493_v24, %v491_v9  ;;  %v508_v35 = vadd.f32 %v507_v25, %v505_v10  ;;  %v522_v36 = vadd.f32 %v521_v28, %v519_v11  ;;  %v535_v30 = vrot.slane %v533_v29, 4 }
 0x1b0   : > { %v500_v45 = vadd.f32 %v499_v31, %v492_v13  ;;  %v514_v38 = vadd.f32 %v513_v32, %v506_v15  ;;  %v528_v40 = vadd.f32 %v527_v33, %v520_v17  ;;  %v542_v43 = vadd.f32 %v541_v34, %v534_v20 }
 0x1b1   : > { %v495_v47 = vrot.slane %v494_v18, 2  ;;  %v509_v48 = vrot.slane %v508_v35, 2  ;;  %v523_v49 = vrot.slane %v522_v36, 2  ;;  %v536_v44 = vadd.f32 %v535_v30, %v533_v29 }
 0x1b2   : > { %v501_v51 = vrot.slane %v500_v45, 2  ;;  %v515_v52 = vrot.slane %v514_v38, 2  ;;  %v529_v53 = vrot.slane %v528_v40, 2  ;;  %v543_v54 = vrot.slane %v542_v43, 2 }
 0x1b3   : > { %v496_v56 = vadd.f32 %v495_v47, %v494_v18  ;;  %v510_v57 = vadd.f32 %v509_v48, %v508_v35  ;;  %v524_v58 = vadd.f32 %v523_v49, %v522_v36  ;;  %v537_v59 = vrot.slane %v536_v44, 2 }
 0x1b4   : > { %v502_v60 = vadd.f32 %v501_v51, %v500_v45  ;;  %v516_v61 = vadd.f32 %v515_v52, %v514_v38  ;;  %v530_v62 = vadd.f32 %v529_v53, %v528_v40  ;;  %v544_v63 = vadd.f32 %v543_v54, %v542_v43 }
 0x1b5   : > { %v497_v0 = vrot.slane %v496_v56, 1  ;;  %v511_v1 = vrot.slane %v510_v57, 1  ;;  %v525_v3 = vrot.slane %v524_v58, 1  ;;  %v538_v9 = vadd.f32 %v537_v59, %v536_v44 }
 0x1b6   : > { %v503_v10 = vrot.slane %v502_v60, 1  ;;  %v517_v11 = vrot.slane %v516_v61, 1  ;;  %v531_v13 = vrot.slane %v530_v62, 1  ;;  %v545_v15 = vrot.slane %v544_v63, 1 }
 0x1b7   : > { %v498_v17 = vadd.f32 %v497_v0, %v496_v56  ;;  %v512_v20 = vadd.f32 %v511_v1, %v510_v57  ;;  %v526_v24 = vadd.f32 %v525_v3, %v524_v58  ;;  %v539_v25 = vrot.slane %v538_v9, 1 }
 0x1b8   : > { %v504_v28 = vadd.f32 %v503_v10, %v502_v60  ;;  %v518_v29 = vadd.f32 %v517_v11, %v516_v61  ;;  %v532_v31 = vadd.f32 %v531_v13, %v530_v62  ;;  %v546_v32 = vadd.f32 %v545_v15, %v544_v63 }
 0x1b9   : > { %v668_v33 = vrot.slane %v2185_v12, %v2201_v22  ;;  %v540_v34 = vadd.f32 %v539_v25, %v538_v9  ;;  %v626_v18 = vadd.f32 %v526_v24, %v498_v17  ;;  %v634_v35 = vsub.f32 %v526_v24, %v498_v17  ;;  %v625_v12 = vld [vmem:[%s218_s27] sm:$0xff] }
 0x1ba   : > { %v627_v36 = vadd.f32 %v532_v31, %v504_v28  ;;  %v631_v30 = vadd.f32 %v546_v32, %v518_v29  ;;  %v635_v45 = vsub.f32 %v532_v31, %v504_v28  ;;  %v637_v38 = vsub.f32 %v546_v32, %v518_v29 }
 0x1bb   : > { %v628_v40 = vmul.f32 0.5, %v626_v18  ;;  %v630_v43 = vadd.f32 %v540_v34, %v512_v20  ;;  %v636_v47 = vsub.f32 %v540_v34, %v512_v20  ;;  %v691_v48 = vmul.f32 %v2303_v37, %v634_v35 }
 0x1bc   : > { %v629_v49 = vmul.f32 0.5, %v627_v36  ;;  %v633_v44 = vmul.f32 0.5, %v631_v30  ;;  %v692_v51 = vmul.f32 %v2305_v46, %v635_v45  ;;  %v700_v52 = vmul.f32 %v2095_v55, %v637_v38 }
 0x1bd   : > { %v632_v53 = vmul.f32 0.5, %v630_v43  ;;  %v649_v22 = vsub.f32 %v628_v40, %v642_v2  ;;  %v693_v54 = vadd.f32 1e-07, %v691_v48  ;;  %v699_v56 = vmul.f32 %v2093_v50, %v636_v47 }
 0x1be   : > { %v650_v57 = vsub.f32 %v629_v49, %v646_v5  ;;  %v676_v58 = vsub.f32 %v633_v44, %v672_v4  ;;  %v694_v59 = vadd.f32 1e-07, %v692_v51  ;;  %v702_v60 = vadd.f32 1e-07, %v700_v52 }
 0x1bf   : > { %v675_v61 = vsub.f32 %v632_v53, %v668_v33  ;;  %2096 = vlog2.f32 %v693_v54  ;;  %v701_v2 = vadd.f32 1e-07, %v699_v56  ;;  %v662_v63 = vmul.f32 %v2303_v37, %v649_v22 }
 0x1c0   : > { %v690_v62 = vmul.f32 %v2095_v55, %v676_v58  ;;  %2098 = vlog2.f32 %v694_v59  ;;  %v664_v0 = vmul.f32 %v2305_v46, %v650_v57 }
 0x1c1   : > { %2100 = vlog2.f32 %v702_v60  ;;  %v688_v5 = vmul.f32 %v2093_v50, %v675_v61  ;;  %v2330_v61 = vand.u32 127, %v253_v14  ;;  %v2343_v14 = vld [vmem:[%s223_s5] sm:$0xff] }
 0x1c2   : > { %2102 = vlog2.f32 %v701_v2  ;;  %v709_v23 = vcombine.low %v662_v63, %v664_v0 }
 0x1c3   : > { %v720_v4 = vcombine.low %v688_v5, %v690_v62  ;;  %v2333_v2 = vadd.s32 128, %v2330_v61  ;;  %v412_v62 = vcvt.s32.f32 %v2330_v61 }
 0x1c4   : > { %v711_v1 = vsub.f32 %v625_v12, %v709_v23 }
 0x1c5   : > { %v721_v3 = vrot.slane %v720_v4, 7  ;;  %v413_v63 = vcvt.s32.f32 %v2333_v2  ;;  %v2345_v4 = vld [vmem:[%s223_s5 + $0x8] sm:$0xff] }
 0x1c6   : > { %v714_v10 = vmul.f32 0.5, %v711_v1  ;;  %v712_v13 = vand.u32 2147483647, %v711_v1 }
 0x1c7   : > { %v723_v9 = vsub.f32 %v625_v12, %v721_v3  ;;  %v577_v3 = vrot.slane %v2345_v4, 4 }
 0x1c8   : > { %v715_v28 = vmul.f32 %v714_v10, %v711_v1  ;;  %v1821_v31 = vadd.f32 -0.5, %v712_v13  ;;  %vm713_vm7 = vcmp.lt.f32.partialorder %v712_v13, 1.0  ;;  %v571_v1 = vrot.slane %v2343_v14, 4 }
 0x1c9   : > { %v2097_v11 = vpop.eup %2096  ;;  %v724_v55 = vand.u32 2147483647, %v723_v9  ;;  %v726_v20 = vmul.f32 0.5, %v723_v9 }
 0x1ca   : > { %v2099_v15 = vpop.eup %2098  ;;  %v696_v17 = vmul.f32 0.6931472, %v2097_v11  ;;  %v717_v30 = vsel %vm713_vm7, %v715_v28, %v1821_v31 }
 0x1cb   : > { %v2101_v24 = vpop.eup %2100  ;;  %v698_v37 = vmul.f32 0.6931472, %v2099_v15  ;;  %vm725_vm6 = vcmp.lt.f32.partialorder %v724_v55, 1.0  ;;  %v727_v46 = vmul.f32 %v726_v20, %v723_v9  ;;  %v1822_v32 = vadd.f32 -0.5, %v724_v55 }
 0x1cc   : > { %v2103_v25 = vpop.eup %2102  ;;  %v706_v50 = vmul.f32 0.6931472, %v2101_v24 }
 0x1cd   : > { %v704_v29 = vmul.f32 0.6931472, %v2103_v25  ;;  %v737_v33 = vcombine.low %v696_v17, %v698_v37  ;;  %v729_v34 = vsel %vm725_vm6, %v727_v46, %v1822_v32 }
 0x1ce   : > { %v1823_v36 = vrot.slane %v729_v34, 9 }
 0x1cf   : > { %v738_v18 = vrot.slane %v737_v33, 6  ;;  %v754_v35 = vcombine.low %v704_v29, %v706_v50 }
 0x1d0   : > { %v734_v40 = vadd.f32 %v1823_v36, %v717_v30 }
 0x1d1   : > { %v740_v45 = vsub.f32 %v625_v12, %v738_v18  ;;  %v755_v38 = vrot.slane %v754_v35, 5 }
 0x1d3   : > { %v741_v43 = vand.u32 2147483647, %v740_v45  ;;  %v743_v47 = vmul.f32 0.5, %v740_v45  ;;  %v757_v48 = vsub.f32 %v625_v12, %v755_v38 }
 0x1d5   : > { %vm742_vm8 = vcmp.lt.f32.partialorder %v741_v43, 1.0  ;;  %v744_v49 = vmul.f32 %v743_v47, %v740_v45  ;;  %v1824_v44 = vadd.f32 -0.5, %v741_v43  ;;  %v758_v51 = vand.u32 2147483647, %v757_v48 }
 0x1d6   : > { %v760_v52 = vmul.f32 0.5, %v757_v48 }
 0x1d7   : > { %v746_v53 = vsel %vm742_vm8, %v744_v49, %v1824_v44  ;;  %vm759_vm9 = vcmp.lt.f32.partialorder %v758_v51, 1.0  ;;  %v1826_v22 = vadd.f32 -0.5, %v758_v51 }
 0x1d8   : > { %v1825_v54 = vrot.slane %v746_v53, 10  ;;  %v761_v56 = vmul.f32 %v760_v52, %v757_v48 }
 0x1da   : > { %v751_v57 = vadd.f32 %v1825_v54, %v734_v40  ;;  %v763_v58 = vsel %vm759_vm9, %v761_v56, %v1826_v22 }
 0x1db   : > { %v1827_v59 = vrot.slane %v763_v58, 11 }
 0x1dd   : > { %v2327_v60 = vadd.f32 %v1827_v59, %v751_v57 }
 0x21f   : > { %v444_v5 = vpop.xlane.xlu1 %443 }
 0x220   : > { %vm445_vm10 = vcmp.eq.f32.partialorder %v2241_v26, %v444_v5  ;;  %vm446_vm11 = vcmp.eq.f32.partialorder %v2243_v27, %v444_v5  ;;  %v572_v26 = vmax.f32 %v2343_v14, %v571_v1  ;;  %v578_v27 = vmax.f32 %v2345_v4, %v577_v3 }
 0x221   : > { %v447_v0 = vsel %vm445_vm10, %v412_v62, 256.0  ;;  %v448_v12 = vsel %vm446_vm11, %v413_v63, 256.0  ;;  %vm456_vm12 = vcmp.gt.f32.partialorder %v444_v5, 1e-05  ;;  %vm800_vm10 = vcmp.eq.s32.totalorder %v2189_v16, %v2330_v61 }
 0x222   : > { %v449_v23 = vmin.f32 %v447_v0, %v448_v12  ;;  %v573_v9 = vrot.slane %v572_v26, 2  ;;  %v579_v10 = vrot.slane %v578_v27, 2 }
 0x223   : > { %v549_v29 = vpop.permute.xlu1 %548 }
 0x224   : > { %450 = vmin.xlane.f32.xlu0 %v449_v23  ;;  %v574_v11 = vmax.f32 %v572_v26, %v573_v9  ;;  %v580_v13 = vmax.f32 %v578_v27, %v579_v10  ;;  %v551_v31 = vmul.f32 %v2282_v7, %v549_v29  ;;  %v552_v34 = vmul.f32 %v2285_v8, %v549_v29 }
 0x226   : > { %v575_v15 = vrot.slane %v574_v11, 1  ;;  %v581_v17 = vrot.slane %v580_v13, 1  ;;  %v553_v18 = vrot.slane %v551_v31, 4  ;;  %v559_v30 = vrot.slane %v552_v34, 4 }
 0x228   : > { %v2351_v55 = vmax.f32 %v574_v11, %v575_v15  ;;  %v2353_v20 = vmax.f32 %v580_v13, %v581_v17  ;;  %v554_v45 = vadd.f32 %v553_v18, %v551_v31  ;;  %v560_v43 = vadd.f32 %v559_v30, %v552_v34 }
 0x229   : > { %v2382_v30 = vadd.s32 32, %v2189_v16 }
 0x22a   : > { %v583_v24 = vsub.f32 %v2343_v14, %v2351_v55  ;;  %v584_v37 = vsub.f32 %v2345_v4, %v2353_v20  ;;  %v555_v47 = vrot.slane %v554_v45, 2  ;;  %v561_v51 = vrot.slane %v560_v43, 2 }
 0x22b   : > { %vm808_vm9 = vcmp.eq.s32.totalorder %v2382_v30, %v2330_v61 }
 0x22c   : > { %v585_v25 = vmul.f32 1.442695, %v583_v24  ;;  %v587_v50 = vmul.f32 1.442695, %v584_v37  ;;  %v556_v8 = vadd.f32 %v555_v47, %v554_v45  ;;  %v562_v54 = vadd.f32 %v561_v51, %v560_v43 }
 0x22d   : > { %v3073_v24 = vmov 0  ;;  %v3075_v37 = vmov 0 }
 0x22e   : > { %2104 = vpow2.f32 %v585_v25  ;;  %v557_v0 = vrot.slane %v556_v8, 1  ;;  %v563_v23 = vrot.slane %v562_v54, 1 }
 0x22f   : > { %2106 = vpow2.f32 %v587_v50 }
 0x230   : > { %v558_v26 = vadd.f32 %v557_v0, %v556_v8  ;;  %v564_v9 = vadd.f32 %v563_v23, %v562_v54  ;;  %v2437_v0 = vadd.s32 24, %v2189_v16 }
 0x232   : > { %v565_v15 = vadd.f32 1.0, %v558_v26  ;;  %v566_v17 = vadd.f32 1.0, %v564_v9  ;;  %v2453_v26 = vadd.s32 40, %v2189_v16 }
 0x238   : > { %v2105_v28 = vpop.eup %2104 }
 0x239   : > { %v2107_v46 = vpop.eup %2106  ;;  %v589_v32 = vrot.slane %v2105_v28, 4 }
 0x23a   : > { %v595_v33 = vrot.slane %v2107_v46, 4 }
 0x23b   : > { %v590_v35 = vadd.f32 %v2105_v28, %v589_v32 }
 0x23c   : > { %v596_v36 = vadd.f32 %v2107_v46, %v595_v33 }
 0x23d   : > { %v591_v38 = vrot.slane %v590_v35, 2 }
 0x23e   : > { %v597_v40 = vrot.slane %v596_v36, 2 }
 0x23f   : > { %v592_v48 = vadd.f32 %v591_v38, %v590_v35 }
 0x240   : > { %v598_v49 = vadd.f32 %v597_v40, %v596_v36  ;;  %v2389_v40 = vadd.s32 8, %v2189_v16 }
 0x241   : > { %v593_v52 = vrot.slane %v592_v48, 1 }
 0x242   : > { %v599_v56 = vrot.slane %v598_v49, 1 }
 0x243   : > { %v594_v12 = vadd.f32 %v593_v52, %v592_v48 }
 0x245   : > { %2108 = vlog2.f32 %v594_v12 }
 0x24f   : > { %v2109_v46 = vpop.eup %2108 }
 0x250   : > { %v618_v34 = vmul.f32 0.6931472, %v2109_v46 }
 0x2b1   : > { %v451_v44 = vpop.xlane.xlu0 %450 }
 0x2b2   : > { %vm454_vm13 = vcmp.eq.f32.partialorder %v412_v62, %v451_v44  ;;  %vm455_vm14 = vcmp.eq.f32.partialorder %v413_v63, %v451_v44  ;;  %v600_v62 = vadd.f32 %v599_v56, %v598_v49  ;;  %v2402_v44 = vadd.s32 16, %v2189_v16 }
 0x2b3   : > { %vm459_vm15 = vmand %vm454_vm13, %vm456_vm12 }
 0x2b4   : > { %vm460_vm0 = vmand %vm455_vm14, %vm456_vm12  ;;  %v1815_v7 = vsel %vm459_vm15, 1.0, %v2128_v6  ;;  %2110 = vlog2.f32 %v600_v62  ;;  %vm802_vm12 = vcmp.eq.s32.totalorder %v2389_v40, %v2330_v61  ;;  %vm804_vm14 = vcmp.eq.s32.totalorder %v2402_v44, %v2330_v61 }
 0x2b5   : > { %v1816_v53 = vsel %vm460_vm0, 1.0, %v2128_v6  ;;  %v465_v22 = vrot.slane %v1815_v7, 4  ;;  %vm806_vm0 = vcmp.eq.s32.totalorder %v2437_v0, %v2330_v61 }
 0x2b6   : > { %v471_v57 = vrot.slane %v1816_v53, 4 }
 0x2b7   : > { %v466_v58 = vmax.f32 %v1815_v7, %v465_v22  ;;  %v1828_v7 = vsel %vm800_vm10, 1.0, %v2128_v6  ;;  %v2419_v22 = vadd.s32 144, %v2189_v16 }
 0x2b8   : > { %v472_v59 = vmax.f32 %v1816_v53, %v471_v57 }
 0x2b9   : > { %v467_v5 = vrot.slane %v466_v58, 2  ;;  %vm837_vm15 = vcmp.eq.s32.totalorder %v2419_v22, %v2333_v2 }
 0x2ba   : > { %v473_v63 = vrot.slane %v472_v59, 2 }
 0x2bb   : > { %v468_v1 = vmax.f32 %v466_v58, %v467_v5  ;;  %v1829_v58 = vsel %vm802_vm12, 1.0, %v2128_v6 }
 0x2bc   : > { %v474_v3 = vmax.f32 %v472_v59, %v473_v63 }
 0x2bd   : > { %v469_v27 = vrot.slane %v468_v1, 1 }
 0x2be   : > { %v475_v10 = vrot.slane %v474_v3, 1  ;;  %v2111_v31 = vpop.eup %2110 }
 0x2bf   : > { %v470_v11 = vmax.f32 %v468_v1, %v469_v27  ;;  %v620_v35 = vmul.f32 0.6931472, %v2111_v31  ;;  %v1830_v1 = vsel %vm804_vm14, 1.0, %v2128_v6 }
 0x2c0   : > { %v476_v13 = vmax.f32 %v474_v3, %v475_v10  ;;  %v2450_v3 = vadd.s32 160, %v2189_v16 }
 0x2c1   : > { %vm477_vm2 = vcmp.gt.f32.partialorder %v470_v11, 0.5  ;;  %v622_v43 = vadd.f32 %v620_v35, %v2353_v20  ;;  %v1832_v20 = vsel %vm808_vm9, 1.0, %v2128_v6 }
 0x2c2   : > { %vm478_vm4 = vcmp.gt.f32.partialorder %v476_v13, 0.5  ;;  %vm2365_vm5 = vmor %vm452_vm1, %vm477_vm2  ;;  %vm841_vm1 = vcmp.eq.s32.totalorder %v2450_v3, %v2333_v2  ;;  %vm810_vm2 = vcmp.eq.s32.totalorder %v2453_v26, %v2330_v61 }
 0x2c3   : > { %v3074_v24 = vsel %vm2365_vm5, 4294967295, %v3073_v24  ;;  %vm2369_vm6 = vmor %vm453_vm3, %vm478_vm4  ;;  %v567_v25 = vsel %vm2365_vm5, %v565_v15, 0.0  ;;  %v1846_v15 = vsel %vm837_vm15, 1.0, %v2128_v6  ;;  %v1833_v31 = vsel %vm810_vm2, 1.0, %v2128_v6 }
 0x2c4   : > { %v3076_v37 = vsel %vm2369_vm6, 4294967295, %v3075_v37  ;;  %v568_v50 = vsel %vm2369_vm6, %v566_v17, 0.0  ;;  %vm601_vm7 = vcmp.eq.f32.partialorder %v2252_v39, %v567_v25  ;;  %v1831_v17 = vsel %vm806_vm0, 1.0, %v2128_v6 }
 0x2c5   : > { %vm602_vm8 = vcmp.eq.f32.partialorder %v2252_v39, %v568_v50  ;;  %v603_v41 = vsel %vm601_vm7, %v2343_v14, 0.0  ;;  %v2385_v39 = vadd.s32 112, %v2189_v16  ;;  %v621_v14 = vadd.f32 %v618_v34, %v2351_v55 }
 0x2c6   : > { %v604_v42 = vsel %vm602_vm8, %v2345_v4, 0.0  ;;  %v605_v28 = vrot.slane %v603_v41, 4  ;;  %v2399_v55 = vadd.s32 128, %v2189_v16  ;;  %v2469_v25 = vadd.s32 176, %v2189_v16 }
 0x2c7   : > { %v611_v29 = vrot.slane %v604_v42, 4  ;;  %vm828_vm11 = vcmp.eq.s32.totalorder %v2385_v39, %v2330_v61  ;;  %v2472_v50 = vadd.s32 48, %v2189_v16 }
 0x2c8   : > { %v606_v32 = vadd.f32 %v605_v28, %v603_v41  ;;  %v1842_v53 = vsel %vm828_vm11, 1.0, %v2128_v6  ;;  %vm833_vm13 = vcmp.eq.s32.totalorder %v2399_v55, %v2333_v2  ;;  %vm845_vm3 = vcmp.eq.s32.totalorder %v2469_v25, %v2333_v2 }
 0x2c9   : > { %v612_v33 = vadd.f32 %v611_v29, %v604_v42  ;;  %v1844_v63 = vsel %vm833_vm13, 1.0, %v2128_v6  ;;  %v1848_v29 = vsel %vm841_vm1, 1.0, %v2128_v6  ;;  %vm812_vm4 = vcmp.eq.s32.totalorder %v2472_v50, %v2330_v61 }
 0x2ca   : > { %v607_v18 = vrot.slane %v606_v32, 2 }
 0x2cb   : > { %v613_v36 = vrot.slane %v612_v33, 2 }
 0x2cc   : > { %v608_v45 = vadd.f32 %v607_v18, %v606_v32  ;;  %v2485_v32 = vadd.s32 192, %v2189_v16 }
 0x2cd   : > { %v614_v38 = vadd.f32 %v613_v36, %v612_v33  ;;  %v2488_v33 = vadd.s32 56, %v2189_v16 }
 0x2ce   : > { %v609_v4 = vrot.slane %v608_v45, 1  ;;  %vm849_vm7 = vcmp.eq.s32.totalorder %v2485_v32, %v2333_v2 }
 0x2cf   : > { %v615_v47 = vrot.slane %v614_v38, 1  ;;  %vm814_vm8 = vcmp.eq.s32.totalorder %v2488_v33, %v2330_v61 }
 0x2d0   : > { %v610_v48 = vadd.f32 %v609_v4, %v608_v45  ;;  %v1850_v45 = vsel %vm845_vm3, 1.0, %v2128_v6  ;;  %v2504_v4 = vadd.s32 64, %v2189_v16 }
 0x2d1   : > { %v616_v49 = vadd.f32 %v615_v47, %v614_v38  ;;  %v1834_v38 = vsel %vm812_vm4, 1.0, %v2128_v6 }
 0x2d2   : > { %v2404_v51 = vsub.f32 %v621_v14, %v610_v48  ;;  %v2501_v14 = vadd.s32 208, %v2189_v16  ;;  %vm816_vm10 = vcmp.eq.s32.totalorder %v2504_v4, %v2330_v61 }
 0x2d3   : > { %v2410_v8 = vsub.f32 %v622_v43, %v616_v49 }
 0x2d4   : > { %v2415_v52 = vsel %vm2365_vm5, -1e+30, %v2404_v51  ;;  %vm853_vm9 = vcmp.eq.s32.totalorder %v2501_v14, %v2333_v2 }
 0x2d5   : > { %v2424_v54 = vsel %vm2369_vm6, -1e+30, %v2410_v8  ;;  %v1002_v56 = vmul.f32 %v1832_v20, %v2415_v52  ;;  %v994_v57 = vmul.f32 %v1828_v7, %v2415_v52  ;;  %v1022_v23 = vmul.f32 %v1842_v53, %v2415_v52 }
 0x2d6   : > { %v2430_v59 = vmul.f32 0.0, %v2424_v54  ;;  %v996_v62 = vmul.f32 %v1829_v58, %v2415_v52  ;;  %v2456_v27 = vmul.f32 0.0, %v2415_v52  ;;  %v1027_v11 = vmul.f32 %v1844_v63, %v2424_v54 }
 0x2d7   : > { %v998_v13 = vmul.f32 %v1830_v1, %v2415_v52  ;;  %v1031_v28 = vmul.f32 %v1846_v15, %v2424_v54  ;;  %v1000_v46 = vmul.f32 %v1831_v17, %v2415_v52  ;;  %v1035_v35 = vmul.f32 %v1848_v29, %v2424_v54 }
 0x2d8   : > { %v1070_v12 = vadd.f32 %v1002_v56, %v2430_v59  ;;  %v1058_v5 = vadd.f32 %v2430_v59, %v994_v57  ;;  %v1100_v9 = vadd.f32 %v1022_v23, %v2430_v59  ;;  %v1061_v10 = vadd.f32 %v996_v62, %v2430_v59 }
 0x2d9   : > { %v1106_v41 = vadd.f32 %v1027_v11, %v2456_v27  ;;  %v1064_v42 = vadd.f32 %v998_v13, %v2430_v59  ;;  %v1112_v34 = vadd.f32 %v1031_v28, %v2456_v27  ;;  %v1067_v18 = vadd.f32 %v1000_v46, %v2430_v59 }
 0x2da   : > { %1071 = vadd.xlane.f32.xlu1 %v1070_v12  ;;  %1059 = vadd.xlane.f32.xlu0 %v1058_v5  ;;  %v1004_v36 = vmul.f32 %v1833_v31, %v2415_v52  ;;  %v1118_v43 = vadd.f32 %v1035_v35, %v2456_v27  ;;  %v1039_v48 = vmul.f32 %v1850_v45, %v2424_v54  ;;  %v1852_v20 = vsel %vm849_vm7, 1.0, %v2128_v6 }
 0x2db   : > { %v1006_v49 = vmul.f32 %v1834_v38, %v2415_v52  ;;  %v1835_v7 = vsel %vm814_vm8, 1.0, %v2128_v6  ;;  %v2517_v53 = vadd.s32 224, %v2189_v16  ;;  %v2520_v56 = vadd.s32 72, %v2189_v16 }
 0x2dc   : > { %v1073_v47 = vadd.f32 %v1004_v36, %v2430_v59  ;;  %v1124_v57 = vadd.f32 %v1039_v48, %v2456_v27  ;;  %v1043_v12 = vmul.f32 %v1852_v20, %v2424_v54  ;;  %v1008_v5 = vmul.f32 %v1835_v7, %v2415_v52 }
 0x2dd   : > { %v1076_v58 = vadd.f32 %v1006_v49, %v2430_v59  ;;  %v1854_v23 = vsel %vm853_vm9, 1.0, %v2128_v6  ;;  %v1836_v62 = vsel %vm816_vm10, 1.0, %v2128_v6  ;;  %vm857_vm11 = vcmp.eq.s32.totalorder %v2517_v53, %v2333_v2 }
 0x2de   : > { %1101 = vadd.xlane.f32.xlu1 %v1100_v9  ;;  %1062 = vadd.xlane.f32.xlu0 %v1061_v10  ;;  %vm818_vm12 = vcmp.eq.s32.totalorder %v2520_v56, %v2330_v61  ;;  %v2533_v63 = vadd.s32 240, %v2189_v16  ;;  %v2536_v1 = vadd.s32 80, %v2189_v16  ;;  %v1130_v9 = vadd.f32 %v1043_v12, %v2456_v27 }
 0x2df   : > { %v1079_v10 = vadd.f32 %v1008_v5, %v2430_v59  ;;  %v1047_v11 = vmul.f32 %v1854_v23, %v2424_v54  ;;  %v1010_v13 = vmul.f32 %v1836_v62, %v2415_v52  ;;  %v1856_v15 = vsel %vm857_vm11, 1.0, %v2128_v6 }
 0x2e0   : > { %v1837_v17 = vsel %vm818_vm12, 1.0, %v2128_v6  ;;  %vm861_vm13 = vcmp.eq.s32.totalorder %v2533_v63, %v2333_v2  ;;  %vm820_vm14 = vcmp.eq.s32.totalorder %v2536_v1, %v2330_v61  ;;  %v1051_v46 = vmul.f32 %v1856_v15, %v2424_v54 }
 0x2e1   : > { %v1082_v28 = vadd.f32 %v1010_v13, %v2430_v59  ;;  %v1012_v29 = vmul.f32 %v1837_v17, %v2415_v52  ;;  %v1858_v31 = vsel %vm861_vm13, 1.0, %v2128_v6  ;;  %v2578_v7 = vsel %vm2365_vm5, 1.0, %v2128_v6 }
 0x2e2   : > { %1107 = vadd.xlane.f32.xlu1 %v1106_v41  ;;  %1065 = vadd.xlane.f32.xlu0 %v1064_v42  ;;  %v2549_v41 = vadd.s32 88, %v2189_v16  ;;  %v1136_v42 = vadd.f32 %v1047_v11, %v2456_v27  ;;  %v1142_v35 = vadd.f32 %v1051_v46, %v2456_v27  ;;  %v1055_v45 = vmul.f32 %v1858_v31, %v2424_v54 }
 0x2e3   : > { %v1085_v36 = vadd.f32 %v1012_v29, %v2430_v59  ;;  %v2589_v12 = vadd.s32 120, %v2189_v16  ;;  %v2607_v17 = vadd.s32 152, %v2189_v16  ;;  %v2615_v29 = vadd.s32 168, %v2189_v16 }
 0x2e4   : > { %vm822_vm15 = vcmp.eq.s32.totalorder %v2549_v41, %v2330_v61  ;;  %v1148_v48 = vadd.f32 %v1055_v45, %v2456_v27 }
 0x2e5   : > { %vm830_vm2 = vcmp.eq.s32.totalorder %v2589_v12, %v2330_v61  ;;  %vm839_vm4 = vcmp.eq.s32.totalorder %v2607_v17, %v2333_v2  ;;  %vm843_vm7 = vcmp.eq.s32.totalorder %v2615_v29, %v2333_v2 }
 0x2e6   : > { %1113 = vadd.xlane.f32.xlu1 %v1112_v34  ;;  %1068 = vadd.xlane.f32.xlu0 %v1067_v18  ;;  %v1838_v34 = vsel %vm820_vm14, 1.0, %v2128_v6  ;;  %v2560_v18 = vadd.s32 96, %v2189_v16  ;;  %v1843_v15 = vsel %vm830_vm2, 1.0, %v2128_v6 }
 0x2e7   : > { %v1014_v38 = vmul.f32 %v1838_v34, %v2415_v52 }
 0x2e8   : > { %vm824_vm0 = vcmp.eq.s32.totalorder %v2560_v18, %v2330_v61 }
 0x2e9   : > { %v1088_v49 = vadd.f32 %v1014_v38, %v2430_v59 }
 0x2ea   : > { %1119 = vadd.xlane.f32.xlu1 %v1118_v43  ;;  %1074 = vadd.xlane.f32.xlu0 %v1073_v47  ;;  %v1839_v43 = vsel %vm822_vm15, 1.0, %v2128_v6  ;;  %v2570_v47 = vadd.s32 104, %v2189_v16 }
 0x2eb   : > { %v1016_v20 = vmul.f32 %v1839_v43, %v2415_v52  ;;  %v1849_v43 = vsel %vm843_vm7, 1.0, %v2128_v6 }
 0x2ec   : > { %vm826_vm1 = vcmp.eq.s32.totalorder %v2570_v47, %v2330_v61 }
 0x2ed   : > { %v1091_v23 = vadd.f32 %v1016_v20, %v2430_v59 }
 0x2ee   : > { %1125 = vadd.xlane.f32.xlu1 %v1124_v57  ;;  %1077 = vadd.xlane.f32.xlu0 %v1076_v58  ;;  %v2583_v57 = vsel %vm2369_vm6, 1.0, %v2128_v6  ;;  %v1840_v58 = vsel %vm824_vm0, 1.0, %v2128_v6  ;;  %vm1282_vm0 = vcmp.lt.s32.totalorder %v2189_v16, %v2330_v61 }
 0x2ef   : > { %v1673_v5 = vadd.f32 %v2583_v57, %v2578_v7  ;;  %v1018_v62 = vmul.f32 %v1840_v58, %v2415_v52  ;;  %v2639_v58 = vadd.s32 216, %v2189_v16 }
 0x2f1   : > { %v1094_v11 = vadd.f32 %v1018_v62, %v2430_v59  ;;  %vm855_vm10 = vcmp.eq.s32.totalorder %v2639_v58, %v2333_v2 }
 0x2f2   : > { %1131 = vadd.xlane.f32.xlu1 %v1130_v9  ;;  %1080 = vadd.xlane.f32.xlu0 %v1079_v10  ;;  %v1841_v9 = vsel %vm826_vm1, 1.0, %v2128_v6  ;;  %v2599_v10 = vadd.s32 136, %v2189_v16 }
 0x2f3   : > { %v1020_v13 = vmul.f32 %v1841_v9, %v2415_v52  ;;  %v2647_v9 = vadd.s32 232, %v2189_v16 }
 0x2f4   : > { %vm835_vm3 = vcmp.eq.s32.totalorder %v2599_v10, %v2333_v2 }
 0x2f5   : > { %v1845_v46 = vsel %vm835_vm3, 1.0, %v2128_v6  ;;  %vm859_vm11 = vcmp.eq.s32.totalorder %v2647_v9, %v2333_v2 }
 0x2f6   : > { %1137 = vadd.xlane.f32.xlu1 %v1136_v42  ;;  %1083 = vadd.xlane.f32.xlu0 %v1082_v28  ;;  %v1097_v42 = vadd.f32 %v1020_v13, %v2430_v59  ;;  %v1024_v28 = vmul.f32 %v1843_v15, %v2415_v52  ;;  %v1029_v34 = vmul.f32 %v1845_v46, %v2424_v54  ;;  %v1855_v15 = vsel %vm855_vm10, 1.0, %v2128_v6 }
 0x2f7   : > { %v1049_v46 = vmul.f32 %v1855_v15, %v2424_v54 }
 0x2f8   : > { %v1103_v31 = vadd.f32 %v1024_v28, %v2430_v59  ;;  %v1109_v45 = vadd.f32 %v1029_v34, %v2456_v27  ;;  %v2631_v59 = vadd.s32 200, %v2189_v16 }
 0x2f9   : > { %v1139_v34 = vadd.f32 %v1049_v46, %v2456_v27 }
 0x2fa   : > { %1143 = vadd.xlane.f32.xlu1 %v1142_v35  ;;  %1086 = vadd.xlane.f32.xlu0 %v1085_v36  ;;  %v1847_v35 = vsel %vm839_vm4, 1.0, %v2128_v6  ;;  %v2623_v36 = vadd.s32 184, %v2189_v16  ;;  %vm851_vm9 = vcmp.eq.s32.totalorder %v2631_v59, %v2333_v2  ;;  %vm1284_vm4 = vcmp.lt.s32.totalorder %v2389_v40, %v2330_v61 }
 0x2fb   : > { %v1033_v38 = vmul.f32 %v1847_v35, %v2424_v54  ;;  %v1853_v62 = vsel %vm851_vm9, 1.0, %v2128_v6 }
 0x2fc   : > { %vm847_vm8 = vcmp.eq.s32.totalorder %v2623_v36, %v2333_v2  ;;  %v1045_v13 = vmul.f32 %v1853_v62, %v2424_v54 }
 0x2fd   : > { %v1851_v20 = vsel %vm847_vm8, 1.0, %v2128_v6 }
 0x2fe   : > { %1149 = vadd.xlane.f32.xlu1 %v1148_v48  ;;  %1089 = vadd.xlane.f32.xlu0 %v1088_v49  ;;  %v1115_v48 = vadd.f32 %v1033_v38, %v2456_v27  ;;  %v1037_v49 = vmul.f32 %v1849_v43, %v2424_v54  ;;  %v1133_v28 = vadd.f32 %v1045_v13, %v2456_v27 }
 0x302   : > { %1674 = vadd.xlane.f32.xlu1 %v1673_v5  ;;  %1092 = vadd.xlane.f32.xlu0 %v1091_v23  ;;  %v1121_v5 = vadd.f32 %v1037_v49, %v2456_v27  ;;  %v1041_v23 = vmul.f32 %v1851_v20, %v2424_v54  ;;  %v2129_v49 = vmov 1.0  }
 0x303   : > { %1666 = vmatprep.mubr.f32.mxu0 %v2129_v49 }
 0x306   : > { %1095 = vadd.xlane.f32.xlu0 %v1094_v11  ;;  %v1127_v11 = vadd.f32 %v1041_v23, %v2456_v27 }
 0x30a   : > { %1098 = vadd.xlane.f32.xlu0 %v1097_v42  ;;  %v2655_v42 = vadd.s32 248, %v2189_v16 }
 0x30c   : > { %vm863_vm12 = vcmp.eq.s32.totalorder %v2655_v42, %v2333_v2 }
 0x30e   : > { %1104 = vadd.xlane.f32.xlu0 %v1103_v31  ;;  %v1857_v31 = vsel %vm859_vm11, 1.0, %v2128_v6 }
 0x30f   : > { %v1053_v35 = vmul.f32 %v1857_v31, %v2424_v54 }
 0x311   : > { %v1145_v38 = vadd.f32 %v1053_v35, %v2456_v27 }
 0x312   : > { %1110 = vadd.xlane.f32.xlu0 %v1109_v45  ;;  %v1859_v45 = vsel %vm863_vm12, 1.0, %v2128_v6 }
 0x313   : > { %v1057_v43 = vmul.f32 %v1859_v45, %v2424_v54 }
 0x316   : > { %1116 = vadd.xlane.f32.xlu0 %v1115_v48  ;;  %v1151_v48 = vadd.f32 %v1057_v43, %v2456_v27  ;;  %v2130_v27 = vmov 1.0|1.0  }
 0x31a   : > { %1122 = vadd.xlane.f32.xlu0 %v1121_v5 }
 0x31e   : > { %1128 = vadd.xlane.f32.xlu0 %v1127_v11 }
 0x322   : > { %1134 = vadd.xlane.f32.xlu0 %v1133_v28 }
 0x326   : > { %1140 = vadd.xlane.f32.xlu0 %v1139_v34 }
 0x32a   : > { %1146 = vadd.xlane.f32.xlu0 %v1145_v38  ;;  %v3103_v38 = vmov 0 }
 0x32e   : > { %1152 = vadd.xlane.f32.xlu0 %v1151_v48 }
 0x367   : > { %v1060_v20 = vpop.xlane.xlu0 %1059  ;;  %v1072_v5 = vpop.xlane.xlu1 %1071 }
 0x368   : > { %vm1155_vm13 = vcmp.gt.f32.partialorder %v1060_v20, %v2424_v54  ;;  %vm1219_vm14 = vcmp.eq.f32.partialorder %v1060_v20, %v2424_v54  ;;  %vm1218_vm15 = vcmp.eq.f32.partialorder %v1060_v20, %v2415_v52  ;;  %vm1154_vm12 = vcmp.gt.f32.partialorder %v1060_v20, %v2415_v52 }
 0x369   : > { %vm1411_vm1 = vmor %vm1155_vm13, %vm1219_vm14  ;;  %v1692_v20 = vcombine.low %v2578_v7, %v2583_v57 }
 0x36a   : > { %vm1346_vm7 = vmand %vm1218_vm15, %vm1282_vm0 }
 0x36b   : > { %v1063_v6 = vpop.xlane.xlu0 %1062  ;;  %vm1410_vm6 = vmor %vm1154_vm12, %vm1346_vm7  ;;  %v2736_v11 = vpop.xlane.xlu1 %1101 }
 0x36c   : > { %vm1157_vm2 = vcmp.gt.f32.partialorder %v1063_v6, %v2424_v54  ;;  %vm1221_vm3 = vcmp.eq.f32.partialorder %v1063_v6, %v2424_v54  ;;  %vm1156_vm9 = vcmp.gt.f32.partialorder %v1063_v6, %v2415_v52  ;;  %vm1220_vm10 = vcmp.eq.f32.partialorder %v1063_v6, %v2415_v52 }
 0x36d   : > { %vm1413_vm8 = vmor %vm1157_vm2, %vm1221_vm3  ;;  %vm1286_vm3 = vcmp.lt.s32.totalorder %v2402_v44, %v2330_v61 }
 0x36e   : > { %vm1992_vm11 = vmpackc.low %vm1413_vm8, %vm1411_vm1 }
 0x36f   : > { %1993 = vmatprep.subr.msk.bf16.mxu0 %vm1992_vm11, %v2130_v27  ;;  %v1066_v16 = vpop.xlane.xlu0 %1065  ;;  %vm1348_vm13 = vmand %vm1220_vm10, %vm1284_vm4 }
 0x370   : > { %vm1412_vm14 = vmor %vm1156_vm9, %vm1348_vm13  ;;  %vm1159_vm5 = vcmp.gt.f32.partialorder %v1066_v16, %v2424_v54  ;;  %vm1223_vm0 = vcmp.eq.f32.partialorder %v1066_v16, %v2424_v54  ;;  %vm1222_vm15 = vcmp.eq.f32.partialorder %v1066_v16, %v2415_v52  ;;  %vm1288_vm9 = vcmp.lt.s32.totalorder %v2437_v0, %v2330_v61 }
 0x371   : > { %vm1994_vm2 = vmpackc.low %vm1412_vm14, %vm1410_vm6  ;;  %vm1158_vm12 = vcmp.gt.f32.partialorder %v1066_v16, %v2415_v52  ;;  %v1694_v16 = vmul.f32 %v1692_v20, %v2327_v60 }
 0x372   : > { %1995 = vmatpush1.bf16.msk.msra.mxu0 %vm1994_vm2, %v2130_v27  ;;  %vm1415_vm1 = vmor %vm1159_vm5, %vm1223_vm0  ;;  %vm1163_vm0 = vcmp.gt.f32.partialorder %v1072_v5, %v2424_v54  ;;  %vm1227_vm2 = vcmp.eq.f32.partialorder %v1072_v5, %v2424_v54 }
 0x373   : > { %v1069_v40 = vpop.xlane.xlu0 %1068  ;;  %vm1350_vm10 = vmand %vm1222_vm15, %vm1286_vm3  ;;  %v1703_v60 = vrot.slane %v1694_v16, %v2198_v21 }
 0x374   : > { %vm1224_vm8 = vcmp.eq.f32.partialorder %v1069_v40, %v2415_v52  ;;  %vm1161_vm4 = vcmp.gt.f32.partialorder %v1069_v40, %v2424_v54  ;;  %vm1225_vm7 = vcmp.eq.f32.partialorder %v1069_v40, %v2424_v54  ;;  %vm1160_vm5 = vcmp.gt.f32.partialorder %v1069_v40, %v2415_v52  ;;  %vm1414_vm14 = vmor %vm1158_vm12, %vm1350_vm10 }
 0x375   : > { %vm1417_vm11 = vmor %vm1161_vm4, %vm1225_vm7  ;;  %vm1226_vm7 = vcmp.eq.f32.partialorder %v1072_v5, %v2415_v52 }
 0x376   : > { %vm1996_vm6 = vmpackc.low %vm1417_vm11, %vm1415_vm1 }
 0x377   : > { %v1075_v23 = vpop.xlane.xlu0 %1074  ;;  %1997 = vmatprep.subr.msk.bf16.mxu0 %vm1996_vm6, %v2130_v27  ;;  %vm1352_vm13 = vmand %vm1224_vm8, %vm1288_vm9  ;;  %vm1290_vm8 = vcmp.lt.s32.totalorder %v2382_v30, %v2330_v61  ;;  %vm1292_vm6 = vcmp.lt.s32.totalorder %v2453_v26, %v2330_v61 }
 0x378   : > { %vm1416_vm3 = vmor %vm1160_vm5, %vm1352_vm13  ;;  %vm1165_vm15 = vcmp.gt.f32.partialorder %v1075_v23, %v2424_v54  ;;  %vm1229_vm4 = vcmp.eq.f32.partialorder %v1075_v23, %v2424_v54  ;;  %vm1228_vm9 = vcmp.eq.f32.partialorder %v1075_v23, %v2415_v52  ;;  %vm1162_vm5 = vcmp.gt.f32.partialorder %v1072_v5, %v2415_v52 }
 0x379   : > { %vm1998_vm1 = vmpackc.low %vm1416_vm3, %vm1414_vm14  ;;  %vm1164_vm13 = vcmp.gt.f32.partialorder %v1075_v23, %v2415_v52  ;;  %v1699_v5 = vrot.slane %v1694_v16, %v2194_v19 }
 0x37a   : > { %1999 = vmatpush1.bf16.msk.msra.mxu0 %vm1998_vm1, %v2130_v27  ;;  %vm1419_vm11 = vmor %vm1163_vm0, %vm1227_vm2 }
 0x37b   : > { %v1078_v44 = vpop.xlane.xlu0 %1077  ;;  %vm1421_vm10 = vmor %vm1165_vm15, %vm1229_vm4 }
 0x37c   : > { %vm2000_vm12 = vmpackc.low %vm1421_vm10, %vm1419_vm11  ;;  %vm1167_vm4 = vcmp.gt.f32.partialorder %v1078_v44, %v2424_v54  ;;  %vm1231_vm15 = vcmp.eq.f32.partialorder %v1078_v44, %v2424_v54 }
 0x37d   : > { %2001 = vmatprep.subr.msk.bf16.mxu0 %vm2000_vm12, %v2130_v27  ;;  %vm1354_vm14 = vmand %vm1226_vm7, %vm1290_vm8  ;;  %vm1230_vm12 = vcmp.eq.f32.partialorder %v1078_v44, %v2415_v52  ;;  %vm1294_vm8 = vcmp.lt.s32.totalorder %v2472_v50, %v2330_v61 }
 0x37e   : > { %vm1356_vm3 = vmand %vm1228_vm9, %vm1292_vm6 }
 0x37f   : > { %v1081_v0 = vpop.xlane.xlu0 %1080  ;;  %vm1418_vm0 = vmor %vm1162_vm5, %vm1354_vm14  ;;  %vm1296_vm5 = vcmp.lt.s32.totalorder %v2488_v33, %v2330_v61  ;;  %vm1166_vm14 = vcmp.gt.f32.partialorder %v1078_v44, %v2415_v52 }
 0x380   : > { %vm1420_vm2 = vmor %vm1164_vm13, %vm1356_vm3  ;;  %vm1169_vm11 = vcmp.gt.f32.partialorder %v1081_v0, %v2424_v54  ;;  %vm1233_vm10 = vcmp.eq.f32.partialorder %v1081_v0, %v2424_v54  ;;  %vm1232_vm9 = vcmp.eq.f32.partialorder %v1081_v0, %v2415_v52  ;;  %vm1168_vm3 = vcmp.gt.f32.partialorder %v1081_v0, %v2415_v52 }
 0x381   : > { %vm2002_vm1 = vmpackc.low %vm1420_vm2, %vm1418_vm0 }
 0x382   : > { %2003 = vmatpush1.bf16.msk.msra.mxu0 %vm2002_vm1, %v2130_v27  ;;  %vm1423_vm7 = vmor %vm1167_vm4, %vm1231_vm15 }
 0x383   : > { %v1084_v62 = vpop.xlane.xlu0 %1083  ;;  %vm1425_vm6 = vmor %vm1169_vm11, %vm1233_vm10 }
 0x384   : > { %vm2004_vm13 = vmpackc.low %vm1425_vm6, %vm1423_vm7  ;;  %vm1171_vm10 = vcmp.gt.f32.partialorder %v1084_v62, %v2424_v54  ;;  %vm1235_vm11 = vcmp.eq.f32.partialorder %v1084_v62, %v2424_v54 }
 0x385   : > { %2005 = vmatprep.subr.msk.bf16.mxu0 %vm2004_vm13, %v2130_v27  ;;  %vm1358_vm0 = vmand %vm1230_vm12, %vm1294_vm8  ;;  %vm1234_vm13 = vcmp.eq.f32.partialorder %v1084_v62, %v2415_v52  ;;  %vm1298_vm12 = vcmp.lt.s32.totalorder %v2504_v4, %v2330_v61 }
 0x386   : > { %vm1360_vm2 = vmand %vm1232_vm9, %vm1296_vm5 }
 0x387   : > { %v1087_v30 = vpop.xlane.xlu0 %1086  ;;  %vm1422_vm1 = vmor %vm1166_vm14, %vm1358_vm0  ;;  %vm1300_vm14 = vcmp.lt.s32.totalorder %v2520_v56, %v2330_v61  ;;  %vm1170_vm0 = vcmp.gt.f32.partialorder %v1084_v62, %v2415_v52  ;;  %v2748_v56 = vpop.xlane.xlu1 %1107 }
 0x388   : > { %vm1424_vm4 = vmor %vm1168_vm3, %vm1360_vm2  ;;  %vm1173_vm7 = vcmp.gt.f32.partialorder %v1087_v30, %v2424_v54  ;;  %vm1237_vm6 = vcmp.eq.f32.partialorder %v1087_v30, %v2424_v54  ;;  %vm1236_vm9 = vcmp.eq.f32.partialorder %v1087_v30, %v2415_v52  ;;  %vm1172_vm2 = vcmp.gt.f32.partialorder %v1087_v30, %v2415_v52 }
 0x389   : > { %vm2006_vm15 = vmpackc.low %vm1424_vm4, %vm1422_vm1 }
 0x38a   : > { %2007 = vmatpush1.bf16.msk.msra.mxu0 %vm2006_vm15, %v2130_v27  ;;  %vm1427_vm8 = vmor %vm1171_vm10, %vm1235_vm11 }
 0x38b   : > { %v1090_v26 = vpop.xlane.xlu0 %1089  ;;  %vm1429_vm5 = vmor %vm1173_vm7, %vm1237_vm6 }
 0x38c   : > { %vm2008_vm3 = vmpackc.low %vm1429_vm5, %vm1427_vm8  ;;  %vm1175_vm10 = vcmp.gt.f32.partialorder %v1090_v26, %v2424_v54  ;;  %vm1239_vm11 = vcmp.eq.f32.partialorder %v1090_v26, %v2424_v54 }
 0x38d   : > { %2009 = vmatprep.subr.msk.bf16.mxu0 %vm2008_vm3, %v2130_v27  ;;  %vm1362_vm1 = vmand %vm1234_vm13, %vm1298_vm12  ;;  %vm1238_vm3 = vcmp.eq.f32.partialorder %v1090_v26, %v2415_v52  ;;  %vm1302_vm13 = vcmp.lt.s32.totalorder %v2536_v1, %v2330_v61  ;;  %v2762_v1 = vpop.xlane.xlu1 %1113 }
 0x38e   : > { %vm1364_vm4 = vmand %vm1236_vm9, %vm1300_vm14 }
 0x38f   : > { %v1093_v50 = vpop.xlane.xlu0 %1092  ;;  %vm1426_vm15 = vmor %vm1170_vm0, %vm1362_vm1  ;;  %vm1304_vm0 = vcmp.lt.s32.totalorder %v2549_v41, %v2330_v61  ;;  %vm1174_vm1 = vcmp.gt.f32.partialorder %v1090_v26, %v2415_v52 }
 0x390   : > { %vm1428_vm7 = vmor %vm1172_vm2, %vm1364_vm4  ;;  %vm1177_vm6 = vcmp.gt.f32.partialorder %v1093_v50, %v2424_v54  ;;  %vm1241_vm8 = vcmp.eq.f32.partialorder %v1093_v50, %v2424_v54  ;;  %vm1240_vm9 = vcmp.eq.f32.partialorder %v1093_v50, %v2415_v52  ;;  %vm1176_vm4 = vcmp.gt.f32.partialorder %v1093_v50, %v2415_v52 }
 0x391   : > { %vm2010_vm5 = vmpackc.low %vm1428_vm7, %vm1426_vm15 }
 0x392   : > { %2011 = vmatpush1.bf16.msk.msra.mxu0 %vm2010_vm5, %v2130_v27  ;;  %vm1431_vm12 = vmor %vm1175_vm10, %vm1239_vm11 }
 0x393   : > { %v1096_v33 = vpop.xlane.xlu0 %1095  ;;  %vm1433_vm14 = vmor %vm1177_vm6, %vm1241_vm8 }
 0x394   : > { %vm2012_vm2 = vmpackc.low %vm1433_vm14, %vm1431_vm12  ;;  %vm1179_vm7 = vcmp.gt.f32.partialorder %v1096_v33, %v2424_v54  ;;  %vm1243_vm5 = vcmp.eq.f32.partialorder %v1096_v33, %v2424_v54 }
 0x395   : > { %2013 = vmatprep.subr.msk.bf16.mxu0 %vm2012_vm2, %v2130_v27  ;;  %vm1366_vm15 = vmand %vm1238_vm3, %vm1302_vm13  ;;  %vm1242_vm2 = vcmp.eq.f32.partialorder %v1096_v33, %v2415_v52  ;;  %vm1306_vm13 = vcmp.lt.s32.totalorder %v2560_v18, %v2330_v61  ;;  %v2780_v18 = vpop.xlane.xlu1 %1119 }
 0x396   : > { %vm1368_vm10 = vmand %vm1240_vm9, %vm1304_vm0 }
 0x397   : > { %v1099_v4 = vpop.xlane.xlu0 %1098  ;;  %vm1430_vm11 = vmor %vm1174_vm1, %vm1366_vm15  ;;  %vm1308_vm1 = vcmp.lt.s32.totalorder %v2570_v47, %v2330_v61  ;;  %vm1178_vm15 = vcmp.gt.f32.partialorder %v1096_v33, %v2415_v52 }
 0x398   : > { %vm1432_vm6 = vmor %vm1176_vm4, %vm1368_vm10  ;;  %vm1181_vm8 = vcmp.gt.f32.partialorder %v1099_v4, %v2424_v54  ;;  %vm1245_vm12 = vcmp.eq.f32.partialorder %v1099_v4, %v2424_v54  ;;  %vm1244_vm9 = vcmp.eq.f32.partialorder %v1099_v4, %v2415_v52  ;;  %vm1180_vm10 = vcmp.gt.f32.partialorder %v1099_v4, %v2415_v52 }
 0x399   : > { %vm2014_vm14 = vmpackc.low %vm1432_vm6, %vm1430_vm11 }
 0x39a   : > { %2015 = vmatpush1.bf16.msk.msra.mxu0 %vm2014_vm14, %v2130_v27  ;;  %vm1435_vm3 = vmor %vm1179_vm7, %vm1243_vm5  ;;  %vm1315_vm7 = vcmp.lt.s32.totalorder %v2399_v55, %v2333_v2  ;;  %vm1251_vm5 = vcmp.eq.f32.partialorder %v2748_v56, %v2424_v54  ;;  %vm1247_vm14 = vcmp.eq.f32.partialorder %v2736_v11, %v2424_v54 }
 0x39b   : > { %v2754_v13 = vpop.xlane.xlu0 %1104  ;;  %vm1437_vm0 = vmor %vm1181_vm8, %vm1245_vm12  ;;  %vm1183_vm12 = vcmp.gt.f32.partialorder %v2736_v11, %v2424_v54 }
 0x39c   : > { %vm2016_vm4 = vmpackc.low %vm1437_vm0, %vm1435_vm3 }
 0x39d   : > { %2017 = vmatprep.subr.msk.bf16.mxu0 %vm2016_vm4, %v2130_v27  ;;  %vm1370_vm11 = vmand %vm1242_vm2, %vm1306_vm13  ;;  %vm1185_vm2 = vcmp.gt.f32.partialorder %v2754_v13, %v2424_v54  ;;  %vm1249_vm13 = vcmp.eq.f32.partialorder %v2754_v13, %v2424_v54  ;;  %vm1317_vm4 = vcmp.lt.s32.totalorder %v2599_v10, %v2333_v2  ;;  %v2813_v10 = vpop.xlane.xlu1 %1125 }
 0x39e   : > { %vm1372_vm6 = vmand %vm1244_vm9, %vm1308_vm1 }
 0x39f   : > { %v2764_v41 = vpop.xlane.xlu0 %1110  ;;  %vm1434_vm8 = vmor %vm1178_vm15, %vm1370_vm11  ;;  %vm1319_vm11 = vcmp.lt.s32.totalorder %v2419_v22, %v2333_v2  ;;  %v3079_v22 = vmov 0 }
 0x3a0   : > { %vm1436_vm3 = vmor %vm1180_vm10, %vm1372_vm6  ;;  %vm1253_vm15 = vcmp.eq.f32.partialorder %v2764_v41, %v2424_v54  ;;  %vm1246_vm10 = vcmp.eq.f32.partialorder %v2736_v11, %v2415_v52  ;;  %vm1310_vm6 = vcmp.lt.s32.totalorder %v2385_v39, %v2330_v61  ;;  %v3081_v39 = vmov 0 }
 0x3a1   : > { %vm2792_vm0 = vmand %vm1251_vm5, %vm1315_vm7  ;;  %vm1255_vm7 = vcmp.eq.f32.partialorder %v2762_v1, %v2424_v54 }
 0x3a2   : > { %vm2018_vm9 = vmpackc.low %vm1436_vm3, %vm1434_vm8  ;;  %vm1248_vm8 = vcmp.eq.f32.partialorder %v2754_v13, %v2415_v52 }
 0x3a3   : > { %v2786_v47 = vpop.xlane.xlu0 %1116  ;;  %2019 = vmatpush1.bf16.msk.msra.mxu0 %vm2018_vm9, %v2130_v27  ;;  %vm1439_vm1 = vmor %vm1183_vm12, %vm1247_vm14  ;;  %vm1312_vm14 = vcmp.lt.s32.totalorder %v2589_v12, %v2330_v61  ;;  %vm1184_vm9 = vcmp.gt.f32.partialorder %v2754_v13, %v2415_v52  ;;  %v2849_v12 = vpop.xlane.xlu1 %1131 }
 0x3a4   : > { %vm1441_vm5 = vmor %vm1185_vm2, %vm1249_vm13  ;;  %vm1182_vm2 = vcmp.gt.f32.partialorder %v2736_v11, %v2415_v52 }
 0x3a5   : > { %vm2020_vm12 = vmpackc.low %vm1441_vm5, %vm1439_vm1  ;;  %vm1259_vm5 = vcmp.eq.f32.partialorder %v2780_v18, %v2424_v54 }
 0x3a6   : > { %2021 = vmatprep.subr.msk.bf16.mxu0 %vm2020_vm12, %v2130_v27  ;;  %vm2816_vm3 = vmand %vm1253_vm15, %vm1317_vm4  ;;  %vm1323_vm15 = vcmp.lt.s32.totalorder %v2450_v3, %v2333_v2  ;;  %v3083_v3 = vmov 0 }
 0x3a7   : > { %v3080_v22 = vsel %vm2816_vm3, 4294967295, %v3079_v22  ;;  %v2822_v15 = vpop.xlane.xlu0 %1122  ;;  %vm2824_vm13 = vmand %vm1255_vm7, %vm1319_vm11  ;;  %vm1321_vm11 = vcmp.lt.s32.totalorder %v2607_v17, %v2333_v2  ;;  %vm1257_vm7 = vcmp.eq.f32.partialorder %v2786_v47, %v2424_v54  ;;  %v2888_v46 = vpop.xlane.xlu1 %1137 }
 0x3a8   : > { %v3082_v39 = vsel %vm2824_vm13, 4294967295, %v3081_v39  ;;  %vm1374_vm1 = vmand %vm1246_vm10, %vm1310_vm6  ;;  %vm1187_vm13 = vcmp.gt.f32.partialorder %v2748_v56, %v2424_v54  ;;  %vm1189_vm10 = vcmp.gt.f32.partialorder %v2764_v41, %v2424_v54 }
 0x3a9   : > { %vm1376_vm4 = vmand %vm1248_vm8, %vm1312_vm14 }
 0x3aa   : > { %vm1438_vm12 = vmor %vm1182_vm2, %vm1374_vm1  ;;  %vm1188_vm2 = vcmp.gt.f32.partialorder %v2764_v41, %v2415_v52  ;;  %vm1263_vm1 = vcmp.eq.f32.partialorder %v2813_v10, %v2424_v54 }
 0x3ab   : > { %vm1440_vm3 = vmor %vm1184_vm9, %vm1376_vm4  ;;  %v2856_v28 = vpop.xlane.xlu0 %1128  ;;  %vm1327_vm9 = vcmp.lt.s32.totalorder %v2469_v25, %v2333_v2  ;;  %vm3087_vm4 = vnez %v3080_v22  ;;  %v3088_v25 = vmov 0  ;;  %v2930_v34 = vpop.xlane.xlu1 %1143 }
 0x3ac   : > { %vm2022_vm6 = vmpackc.low %vm1440_vm3, %vm1438_vm12  ;;  %vm1261_vm12 = vcmp.eq.f32.partialorder %v2822_v15, %v2424_v54 }
 0x3ad   : > { %vm2845_vm8 = vmand %vm1259_vm5, %vm1323_vm15  ;;  %2023 = vmatpush1.bf16.msk.msra.mxu0 %vm2022_vm6, %v2130_v27  ;;  %vm1325_vm5 = vcmp.lt.s32.totalorder %v2615_v29, %v2333_v2 }
 0x3ae   : > { %v3084_v3 = vsel %vm2845_vm8, 4294967295, %v3083_v3  ;;  %vm2852_vm14 = vmand %vm1257_vm7, %vm1321_vm11  ;;  %vm1186_vm11 = vcmp.gt.f32.partialorder %v2748_v56, %v2415_v52  ;;  %vm1193_vm7 = vcmp.gt.f32.partialorder %v2786_v47, %v2424_v54 }
 0x3af   : > { %vm1443_vm3 = vmor %vm1187_vm13, %vm2792_vm0  ;;  %vm1191_vm0 = vcmp.gt.f32.partialorder %v2762_v1, %v2424_v54  ;;  %v2894_v31 = vpop.xlane.xlu0 %1134  ;;  %v1150_v45 = vpop.xlane.xlu1 %1149 }
 0x3b0   : > { %vm1445_vm15 = vmor %vm1189_vm10, %vm3087_vm4 }
 0x3b1   : > { %vm2024_vm13 = vmpackc.low %vm1445_vm15, %vm1443_vm3  ;;  %vm1192_vm3 = vcmp.gt.f32.partialorder %v2786_v47, %v2415_v52  ;;  %vm3092_vm15 = vnez %v3082_v39 }
 0x3b2   : > { %2025 = vmatprep.subr.msk.bf16.mxu0 %vm2024_vm13, %v2130_v27  ;;  %vm2026_vm6 = vmpackc.low %vm1188_vm2, %vm1186_vm11  ;;  %vm1331_vm2 = vcmp.lt.s32.totalorder %v2485_v32, %v2333_v2  ;;  %vm1190_vm11 = vcmp.gt.f32.partialorder %v2762_v1, %v2415_v52  ;;  %v3093_v32 = vmov 0 }
 0x3b3   : > { %vm2879_vm10 = vmand %vm1263_vm1, %vm1327_vm9  ;;  %2027 = vmatpush1.bf16.msk.msra.mxu0 %vm2026_vm6, %v2130_v27  ;;  %vm1267_vm9 = vcmp.eq.f32.partialorder %v2849_v12, %v2424_v54  ;;  %vm1197_vm6 = vcmp.gt.f32.partialorder %v2822_v15, %v2424_v54  ;;  %v1141_v35 = vpop.xlane.xlu0 %1140 }
 0x3b4   : > { %v3089_v25 = vsel %vm2879_vm10, 4294967295, %v3088_v25  ;;  %vm2884_vm4 = vmand %vm1261_vm12, %vm1325_vm5  ;;  %vm1329_vm5 = vcmp.lt.s32.totalorder %v2623_v36, %v2333_v2  ;;  %vm1265_vm12 = vcmp.eq.f32.partialorder %v2856_v28, %v2424_v54  ;;  %vm1196_vm10 = vcmp.gt.f32.partialorder %v2822_v15, %v2415_v52 }
 0x3b5   : > { %vm1447_vm8 = vmor %vm1191_vm0, %vm3092_vm15  ;;  %vm1195_vm0 = vcmp.gt.f32.partialorder %v2780_v18, %v2424_v54 }
 0x3b6   : > { %vm1449_vm1 = vmor %vm1193_vm7, %vm2852_vm14 }
 0x3b7   : > { %vm2028_vm13 = vmpackc.low %vm1449_vm1, %vm1447_vm8  ;;  %vm3097_vm8 = vnez %v3084_v3 }
 0x3b8   : > { %2029 = vmatprep.subr.msk.bf16.mxu0 %vm2028_vm13, %v2130_v27  ;;  %vm2030_vm15 = vmpackc.low %vm1192_vm3, %vm1190_vm11  ;;  %vm1335_vm13 = vcmp.lt.s32.totalorder %v2501_v14, %v2333_v2  ;;  %vm1271_vm3 = vcmp.eq.f32.partialorder %v2888_v46, %v2424_v54  ;;  %vm1199_vm11 = vcmp.gt.f32.partialorder %v2813_v10, %v2424_v54  ;;  %v3098_v14 = vmov 0 }
 0x3b9   : > { %vm2913_vm14 = vmand %vm1267_vm9, %vm1331_vm2  ;;  %2031 = vmatpush1.bf16.msk.msra.mxu0 %vm2030_vm15, %v2130_v27  ;;  %vm1333_vm9 = vcmp.lt.s32.totalorder %v2631_v59, %v2333_v2  ;;  %vm1201_vm15 = vcmp.gt.f32.partialorder %v2856_v28, %v2424_v54 }
 0x3ba   : > { %v3094_v32 = vsel %vm2913_vm14, 4294967295, %v3093_v32  ;;  %vm2918_vm7 = vmand %vm1265_vm12, %vm1329_vm5  ;;  %vm1269_vm5 = vcmp.eq.f32.partialorder %v2894_v31, %v2424_v54  ;;  %vm1194_vm12 = vcmp.gt.f32.partialorder %v2780_v18, %v2415_v52  ;;  %vm1200_vm14 = vcmp.gt.f32.partialorder %v2856_v28, %v2415_v52 }
 0x3bb   : > { %vm1451_vm1 = vmor %vm1195_vm0, %vm3097_vm8 }
 0x3bc   : > { %vm1453_vm2 = vmor %vm1197_vm6, %vm2884_vm4 }
 0x3bd   : > { %vm2032_vm0 = vmpackc.low %vm1453_vm2, %vm1451_vm1  ;;  %vm3102_vm1 = vnez %v3089_v25 }
 0x3be   : > { %2033 = vmatprep.subr.msk.bf16.mxu0 %vm2032_vm0, %v2130_v27  ;;  %vm2034_vm4 = vmpackc.low %vm1196_vm10, %vm1194_vm12  ;;  %vm1339_vm0 = vcmp.lt.s32.totalorder %v2517_v53, %v2333_v2  ;;  %vm1275_vm10 = vcmp.eq.f32.partialorder %v2930_v34, %v2424_v54  ;;  %vm1203_vm12 = vcmp.gt.f32.partialorder %v2849_v12, %v2424_v54  ;;  %v1147_v53 = vpop.xlane.xlu0 %1146 }
 0x3bf   : > { %vm2945_vm6 = vmand %vm1271_vm3, %vm1335_vm13  ;;  %2035 = vmatpush1.bf16.msk.msra.mxu0 %vm2034_vm4, %v2130_v27  ;;  %vm1337_vm3 = vcmp.lt.s32.totalorder %v2639_v58, %v2333_v2  ;;  %vm1205_vm4 = vcmp.gt.f32.partialorder %v2894_v31, %v2424_v54 }
 0x3c0   : > { %v3099_v14 = vsel %vm2945_vm6, 4294967295, %v3098_v14  ;;  %vm2950_vm8 = vmand %vm1269_vm5, %vm1333_vm9  ;;  %vm1273_vm9 = vcmp.eq.f32.partialorder %v1141_v35, %v2424_v54  ;;  %vm1198_vm5 = vcmp.gt.f32.partialorder %v2813_v10, %v2415_v52  ;;  %vm1204_vm6 = vcmp.gt.f32.partialorder %v2894_v31, %v2415_v52 }
 0x3c1   : > { %vm1455_vm2 = vmor %vm1199_vm11, %vm3102_vm1 }
 0x3c2   : > { %vm1457_vm13 = vmor %vm1201_vm15, %vm2918_vm7  ;;  %v1153_v43 = vpop.xlane.xlu0 %1152 }
 0x3c3   : > { %vm2036_vm11 = vmpackc.low %vm1457_vm13, %vm1455_vm2  ;;  %vm1343_vm2 = vcmp.lt.s32.totalorder %v2533_v63, %v2333_v2  ;;  %vm1279_vm13 = vcmp.eq.f32.partialorder %v1150_v45, %v2424_v54  ;;  %v3108_v63 = vmov 0 }
 0x3c4   : > { %2037 = vmatprep.subr.msk.bf16.mxu0 %vm2036_vm11, %v2130_v27  ;;  %vm2038_vm7 = vmpackc.low %vm1200_vm14, %vm1198_vm5  ;;  %vm3107_vm14 = vnez %v3094_v32  ;;  %vm1202_vm5 = vcmp.gt.f32.partialorder %v2849_v12, %v2415_v52  ;;  %vm1207_vm11 = vcmp.gt.f32.partialorder %v2888_v46, %v2424_v54 }
 0x3c5   : > { %vm2974_vm15 = vmand %vm1275_vm10, %vm1339_vm0  ;;  %2039 = vmatpush1.bf16.msk.msra.mxu0 %vm2038_vm7, %v2130_v27 }
 0x3c6   : > { %v3104_v38 = vsel %vm2974_vm15, 4294967295, %v3103_v38  ;;  %vm2979_vm1 = vmand %vm1273_vm9, %vm1337_vm3  ;;  %vm1341_vm3 = vcmp.lt.s32.totalorder %v2647_v9, %v2333_v2  ;;  %vm1277_vm9 = vcmp.eq.f32.partialorder %v1147_v53, %v2424_v54 }
 0x3c7   : > { %vm1459_vm0 = vmor %vm1203_vm12, %vm3107_vm14  ;;  %vm1209_vm12 = vcmp.gt.f32.partialorder %v1141_v35, %v2424_v54  ;;  %vm1208_vm14 = vcmp.gt.f32.partialorder %v1141_v35, %v2415_v52 }
 0x3c8   : > { %vm1461_vm10 = vmor %vm1205_vm4, %vm2950_vm8 }
 0x3c9   : > { %vm2040_vm7 = vmpackc.low %vm1461_vm10, %vm1459_vm0  ;;  %vm3112_vm0 = vnez %v3099_v14  ;;  %vm1345_vm10 = vcmp.lt.s32.totalorder %v2655_v42, %v2333_v2  ;;  %v1675_v2 = vpop.xlane.xlu1 %1674 }
 0x3ca   : > { %vm2999_vm15 = vmand %vm1279_vm13, %vm1343_vm2  ;;  %2041 = vmatprep.subr.msk.bf16.mxu0 %vm2040_vm7, %v2130_v27  ;;  %vm1213_vm7 = vcmp.gt.f32.partialorder %v1147_v53, %v2424_v54  ;;  %v1677_v42 = vsub.f32 256.0, %v1675_v2 }
 0x3cb   : > { %v3109_v63 = vsel %vm2999_vm15, 4294967295, %v3108_v63  ;;  %vm2042_vm8 = vmpackc.low %vm1204_vm6, %vm1202_vm5  ;;  %vm1281_vm6 = vcmp.eq.f32.partialorder %v1153_v43, %v2424_v54  ;;  %vm1206_vm5 = vcmp.gt.f32.partialorder %v2888_v46, %v2415_v52  ;;  %vm1215_vm15 = vcmp.gt.f32.partialorder %v1150_v45, %v2424_v54 }
 0x3cc   : > { %2043 = vmatpush1.bf16.msk.msra.mxu0 %vm2042_vm8, %v2130_v27  ;;  %vm3006_vm4 = vmand %vm1277_vm9, %vm1341_vm3  ;;  %vm1211_vm3 = vcmp.gt.f32.partialorder %v2930_v34, %v2424_v54  ;;  %vm3113_vm8 = vnez %v3104_v38 }
 0x3cd   : > { %vm1463_vm2 = vmor %vm1207_vm11, %vm3112_vm0 }
 0x3ce   : > { %vm1465_vm13 = vmor %vm1209_vm12, %vm2979_vm1  ;;  %vm1212_vm12 = vcmp.gt.f32.partialorder %v1147_v53, %v2415_v52 }
 0x3cf   : > { %vm2044_vm9 = vmpackc.low %vm1465_vm13, %vm1463_vm2  ;;  %vm1210_vm13 = vcmp.gt.f32.partialorder %v2930_v34, %v2415_v52 }
 0x3d0   : > { %2045 = vmatprep.subr.msk.bf16.mxu0 %vm2044_vm9, %v2130_v27  ;;  %vm2046_vm11 = vmpackc.low %vm1208_vm14, %vm1206_vm5  ;;  %vm1217_vm9 = vcmp.gt.f32.partialorder %v1153_v43, %v2424_v54  ;;  %v1676_v54 = vmul.f32 3.0, %v1675_v2 }
 0x3d1   : > { %2047 = vmatpush1.bf16.msk.msra.mxu0 %vm2046_vm11, %v2130_v27  ;;  %vm1409_vm1 = vmand %vm1281_vm6, %vm1345_vm10  ;;  %vm1216_vm10 = vcmp.gt.f32.partialorder %v1153_v43, %v2415_v52  ;;  %vm3114_vm6 = vnez %v3109_v63 }
 0x3d2   : > { %vm1467_vm0 = vmor %vm1211_vm3, %vm3113_vm8  ;;  %vm1214_vm8 = vcmp.gt.f32.partialorder %v1150_v45, %v2415_v52  ;;  %v1678_v48 = vmin.f32 %v1676_v54, %v1677_v42 }
 0x3d3   : > { %vm1469_vm2 = vmor %vm1213_vm7, %vm3006_vm4 }
 0x3d4   : > { %vm2048_vm5 = vmpackc.low %vm1469_vm2, %vm1467_vm0  ;;  %v1679_v6 = vmax.f32 %v1678_v48, 0.0 }
 0x3d5   : > { %2049 = vmatprep.subr.msk.bf16.mxu0 %vm2048_vm5, %v2130_v27  ;;  %vm2050_vm14 = vmpackc.low %vm1212_vm12, %vm1210_vm13  ;;  %vm3115_vm12 = vnez %v3074_v24  ;;  %vm3116_vm13 = vnez %v3076_v37 }
 0x3d6   : > { %2051 = vmatpush1.bf16.msk.msra.mxu0 %vm2050_vm14, %v2130_v27  ;;  %vm1471_vm3 = vmor %vm1215_vm15, %vm3114_vm6  ;;  %vm1680_vm15 = vcmp.gt.f32.partialorder %v1675_v2, 0.0  ;;  %vm1706_vm6 = vcmask 1040384  }
 0x3d7   : > { %vm1473_vm11 = vmor %vm1217_vm9, %vm1409_vm1  ;;  %v1681_v40 = vsel %vm1680_vm15, %v1679_v6, 60.0  ;;  %vm2131_vm1 = vmmov 1   ;;  %v1707_v50 = vsel %vm1706_vm6, %v1699_v5, 0.0 }
 0x3d8   : > { %vm2052_vm4 = vmpackc.low %vm1473_vm11, %vm1471_vm3  ;;  %vm1727_vm3 = vcmp.eq.s32.totalorder %v2330_v61, 2  ;;  %vm1726_vm11 = vcmp.eq.s32.totalorder %v2330_v61, 1 }
 0x3d9   : > { %2053 = vmatprep.subr.msk.bf16.mxu0 %vm2052_vm4, %v2130_v27  ;;  %vm2054_vm7 = vmpackc.low %vm1216_vm10, %vm1214_vm8  ;;  %vm1725_vm8 = vcmp.eq.s32.totalorder %v2330_v61, 0  ;;  %vm1731_vm4 = vcmask 24576  }
 0x3da   : > { %2055 = vmatpush1.bf16.msk.msra.mxu0 %vm2054_vm7, %v2130_v27  ;;  %vm1684_vm0 = vmxor %vm3115_vm12, %vm2131_vm1 }
 0x3db   : > { %vm1685_vm9 = vmxor %vm3116_vm13, %vm2131_vm1 }
 0x3dd   : > { %1667 = vmatmul.mubr.f32.vlgmr.msra.gmra.mrb[0].mxu0 %v2129_v49 }
 0x4b0   : > { %v1668_v52 = vpop.f32.mrb[0].mxu0 }
 0x4b1   : > { %vm1682_vm2 = vcmp.lt.f32.partialorder %v1668_v52, %v1681_v40  ;;  %v1670_v27 = vpop.f32.mrb[1].mxu0 }
 0x4b2   : > { %vm1686_vm5 = vmand %vm1682_vm2, %vm1684_vm0  ;;  %vm1683_vm14 = vcmp.lt.f32.partialorder %v1670_v27, %v1681_v40 }
 0x4b3   : > { %v1688_v49 = vsel %vm1686_vm5, 1.0, %v2578_v7  ;;  %vm1687_vm10 = vmand %vm1683_vm14, %vm1685_vm9  ;;  %v1708_v7 = vsel %vm1706_vm6, %v1703_v60, 0.0 }
 0x4b4   : > { %v1712_v23 = vmul.f32 %v1688_v49, %v2404_v51  ;;  %v1689_v24 = vsel %vm1687_vm10, 1.0, %v2583_v57  ;;  %v1719_v44 = vsel %vm1706_vm6, %v1688_v49, 0.0  ;;  %v1709_v19 = vadd.f32 %v1708_v7, %v1707_v50 }
 0x4b5   : > { %v1713_v0 = vmul.f32 %v1689_v24, %v2410_v8  ;;  %v1720_v62 = vsel %vm1706_vm6, %v1689_v24, 0.0 }
 0x4b6   : > { %v1721_v37 = vadd.f32 %v1720_v62, %v1719_v44  ;;  %v1714_v30 = vsel %vm1706_vm6, %v1712_v23, 0.0 }
 0x4b7   : > { %v1715_v26 = vsel %vm1706_vm6, %v1713_v0, 0.0 }
 0x4b8   : > { %1722 = vadd.xlane.f32.xlu0 %v1721_v37  ;;  %v1716_v33 = vadd.f32 %v1715_v26, %v1714_v30 }
 0x4ba   : > { %1717 = vadd.xlane.f32.xlu1 %v1716_v33 }
 0x4bc   : > { %1710 = vadd.xlane.f32.xlu0 %v1709_v19 }
 0x545   : > { %v1723_v21 = vpop.xlane.xlu0 %1722 }
 0x546   : > { %v1724_v51 = vsub.f32 %v1723_v21, %v1675_v2 }
 0x547   : > { %v1718_v57 = vpop.xlane.xlu1 %1717 }
 0x548   : > { %v1728_v8 = vsel %vm1727_vm3, %v1675_v2, %v1724_v51 }
 0x549   : > { %v1729_v11 = vsel %vm1726_vm11, %v1718_v57, %v1728_v8  ;;  %v1711_v4 = vpop.xlane.xlu0 %1710 }
 0x54a   : > { %v1730_v56 = vsel %vm1725_vm8, %v1711_v4, %v1729_v11 }
 0x54b   : > { %1732 = vst.msk [vmem:[%s230_s8] sm:$0x1] %vm1731_vm4, %v1730_v56 }
 0x54c PF: > { %s14_s15 = sadd.s32 1, %s2118_s15  }
 0x54d   : > { %p11_p4 = scmp.ge.s32.totalorder %s14_s15, 4  }
 0x54f   :  { %13 = sbr.rel (!%p11_p4) target bundleno = 1 (0x1), region = 72 }

</bundles_post_ra>
